<compile_context>
chip_gen: v7x
topology: tpu7x:2x2x1
jax: 0.10.0
libtpu: 0.0.40
codegen_flags: <defaults>
</compile_context>

<pallas_src>
import functools

import jax
import jax.numpy as jnp
from jax.experimental import pallas as pl
from jax.experimental.pallas import tpu as pltpu

_BN_EPS = 1e-5
_LANES = 128


def _round_up(v, m):
    return (v + m - 1) // m * m


def _conv_stats_kernel(x_ref, w_ref, y_ref, stats_ref, col_ref, *, tile_h, img_w):
    """Per-(batch, row-block) tile: 3x3 conv as one K-folded matmul + BN partials.

    x_ref:     ((TH+2)*(W+2)+2, Cin_pad)  f32 row-major padded-input slab (2 guard rows)
    w_ref:     (9*Cin_pad, Cout_pad)      compute dtype, tap-major folded weights
    y_ref:     (TH*(W+2), Cout_pad)       compute dtype, conv output (pad cols are junk)
    stats_ref: (2, Cout_pad)              f32, [sum, sum_of_squares] over valid columns
    col_ref:   (TH*(W+2), 9*Cin_pad)      compute dtype, im2col VMEM scratch
    """
    wp = img_w + 2
    m = tile_h * wp
    cin = x_ref.shape[-1]

    # Build the im2col tile: tap (dy, dx) of the 3x3 stencil is the same row-major
    # slab shifted by dy*(W+2)+dx rows.  The two pad columns per row absorb the row
    # wrap-around; those output columns are masked below and sliced off in glue.
    for t in range(9):
        dy, dx = divmod(t, 3)
        off = dy * wp + dx
        col_ref[:, t * cin:(t + 1) * cin] = (
            x_ref[off:off + m, :].astype(col_ref.dtype))

    # One MXU matmul with K = 9*Cin_pad, f32 accumulation; single output write.
    acc = jnp.dot(col_ref[...], w_ref[...], preferred_element_type=jnp.float32)
    y_ref[...] = acc.astype(y_ref.dtype)

    # Per-channel BN partial statistics over the *valid* output columns only.
    col_idx = jax.lax.broadcasted_iota(jnp.int32, (m, 1), 0) % wp
    valid = (col_idx < img_w).astype(jnp.float32)
    stats_ref[pl.ds(0, 1), :] = jnp.sum(acc * valid, axis=0, keepdims=True)
    stats_ref[pl.ds(1, 1), :] = jnp.sum(acc * acc * valid, axis=0, keepdims=True)


def _bn_prelu_kernel(y_ref, scale_ref, shift_ref, slope_ref, o_ref):
    """z = y*scale + shift ; out = where(z >= 0, z, slope*z)  (all math in f32)."""
    z = y_ref[...].astype(jnp.float32) * scale_ref[...] + shift_ref[...]
    o_ref[...] = jnp.where(z >= 0.0, z, slope_ref[...] * z)


@functools.partial(jax.jit, static_argnames=("tile_h", "compute_dtype"))
def conv_prelu(x, weight, bias, gamma, beta, slope, *, tile_h=None,
               compute_dtype=jnp.bfloat16):
    """ConvPRelu forward: Conv2d(3x3, pad=1) -> BatchNorm2d (batch stats) -> PReLU.

    x: (N, Cin, H, W) f32 NCHW; weight: (Cout, Cin, 3, 3); gamma/beta/slope: (Cout,).
    `bias` is accepted for interface parity but is provably a no-op: training-mode BN
    subtracts the per-channel mean, which cancels any per-channel constant exactly.
    """
    del bias
    n, c_in, h, w = x.shape
    c_out = weight.shape[0]
    c_in_p = _round_up(c_in, _LANES)
    c_out_p = _round_up(c_out, _LANES)

    # Row-block height: aim for ~512-1024 im2col rows per tile; must divide H.
    if tile_h is None:
        tile_h = max(1, 768 // (w + 2))
    th = min(h, max(1, int(tile_h)))
    while h % th:
        th -= 1
    r_blocks = h // th
    wp = w + 2
    m = th * wp                    # im2col rows per tile (incl. 2 junk cols per row)
    m2 = (th + 2) * wp + 2         # slab rows per tile (+2 guard rows for the shifts)
    k = 9 * c_in_p

    # ---- glue: NCHW -> NHWC, channel pad to 128 lanes, spatial zero-pad, and
    #      per-row-block overlapping slabs (2-row halo), flattened row-major. ----
    x_nhwc = jnp.transpose(x, (0, 2, 3, 1)).astype(jnp.float32)
    x_nhwc = jnp.pad(x_nhwc, ((0, 0), (0, 0), (0, 0), (0, c_in_p - c_in)))
    x_pad = jnp.pad(x_nhwc, ((0, 0), (1, 1), (1, 1), (0, 0)))
    slabs = [x_pad[:, r * th:r * th + th + 2].reshape(n, (th + 2) * wp, c_in_p)
             for r in range(r_blocks)]
    x_slabs = jnp.stack(slabs, axis=1)                            # (N, R, (TH+2)*Wp, Cp)
    x_slabs = jnp.pad(x_slabs, ((0, 0), (0, 0), (0, 2), (0, 0)))  # guard rows (zeros)
    # TODO(synk): ship the slab as bf16 once packed sublane-offset loads are vetted;
    # kept f32 so the 9 shifted reads inside the kernel are plain 32-bit offset loads.

    # weight (Cout, Cin, 3, 3) -> (9*Cin_p, Cout_p), tap-major / channel-minor rows.
    w_t = jnp.transpose(weight, (2, 3, 1, 0)).astype(jnp.float32)  # (3, 3, Cin, Cout)
    w_t = jnp.pad(w_t, ((0, 0), (0, 0), (0, c_in_p - c_in), (0, c_out_p - c_out)))
    w_mat = w_t.reshape(k, c_out_p).astype(compute_dtype)

    kernel1 = functools.partial(_conv_stats_kernel, tile_h=th, img_w=w)
    flops = 2 * n * r_blocks * m * k * c_out_p
    bytes_accessed = (x_slabs.size * 4
                      + w_mat.size * jnp.dtype(compute_dtype).itemsize
                      + n * r_blocks * m * c_out_p
                      * jnp.dtype(compute_dtype).itemsize)
    compiler_params = pltpu.CompilerParams(
        dimension_semantics=("parallel", "parallel"),
        vmem_limit_bytes=32 * 1024 * 1024)

    # ---- pass 1: conv (single K-folded MXU matmul per tile) + BN partial stats ----
    y, stats = pl.pallas_call(
        kernel1,
        grid=(n, r_blocks),
        in_specs=[
            pl.BlockSpec((None, None, m2, c_in_p), lambda i, j: (i, j, 0, 0)),
            pl.BlockSpec((k, c_out_p), lambda i, j: (0, 0)),
        ],
        out_specs=[
            pl.BlockSpec((None, None, m, c_out_p), lambda i, j: (i, j, 0, 0)),
            pl.BlockSpec((None, None, 2, c_out_p), lambda i, j: (i, j, 0, 0)),
        ],
        out_shape=[
            jax.ShapeDtypeStruct((n, r_blocks, m, c_out_p), compute_dtype),
            jax.ShapeDtypeStruct((n, r_blocks, 2, c_out_p), jnp.float32),
        ],
        scratch_shapes=[pltpu.VMEM((m, k), compute_dtype)],
        compiler_params=compiler_params,
        cost_estimate=pl.CostEstimate(flops=flops, transcendentals=0,
                                      bytes_accessed=bytes_accessed),
    )(x_slabs, w_mat)

    # ---- tiny XLA finalize of the per-channel BN statistics ----
    s = jnp.sum(stats, axis=(0, 1))                      # (2, Cout_p) f32
    count = jnp.float32(n * h * w)                       # exact element count
    mean = s[0] / count
    var = jnp.maximum(s[1] / count - mean * mean, 0.0)   # biased (training-mode) var
    gamma_p = jnp.pad(gamma.astype(jnp.float32), (0, c_out_p - c_out))
    beta_p = jnp.pad(beta.astype(jnp.float32), (0, c_out_p - c_out))
    slope_p = jnp.pad(slope.astype(jnp.float32), (0, c_out_p - c_out))
    scale = gamma_p * jax.lax.rsqrt(var + _BN_EPS)
    shift = beta_p - mean * scale
    scale = scale.reshape(1, c_out_p)
    shift = shift.reshape(1, c_out_p)
    slope2 = slope_p.reshape(1, c_out_p)

    # ---- pass 2: normalize + PReLU (elementwise, lane-dense tiles) ----
    out = pl.pallas_call(
        _bn_prelu_kernel,
        grid=(n, r_blocks),
        in_specs=[
            pl.BlockSpec((None, None, m, c_out_p), lambda i, j: (i, j, 0, 0)),
            pl.BlockSpec((1, c_out_p), lambda i, j: (0, 0)),
            pl.BlockSpec((1, c_out_p), lambda i, j: (0, 0)),
            pl.BlockSpec((1, c_out_p), lambda i, j: (0, 0)),
        ],
        out_specs=pl.BlockSpec((None, None, m, c_out_p), lambda i, j: (i, j, 0, 0)),
        out_shape=jax.ShapeDtypeStruct((n, r_blocks, m, c_out_p), jnp.float32),
        compiler_params=compiler_params,
    )(y, scale, shift, slope2)

    # ---- glue: drop junk columns + channel padding, back to NCHW ----
    out = out.reshape(n, r_blocks, th, wp, c_out_p)[:, :, :, :w, :c_out]
    out = out.reshape(n, h, w, c_out)
    return jnp.transpose(out, (0, 3, 1, 2))


def _reference(x, weight, bias, gamma, beta, slope):
    """Pure-JAX f32 reference mirroring PyTorch ConvPRelu.forward (training-mode BN)."""
    y = jax.lax.conv_general_dilated(
        x, weight, window_strides=(1, 1), padding=((1, 1), (1, 1)),
        dimension_numbers=("NCHW", "OIHW", "NCHW"))
    y = y + bias[None, :, None, None]
    mean = jnp.mean(y, axis=(0, 2, 3), keepdims=True)
    var = jnp.mean(jnp.square(y - mean), axis=(0, 2, 3), keepdims=True)
    y = (y - mean) * jax.lax.rsqrt(var + _BN_EPS)
    y = y * gamma[None, :, None, None] + beta[None, :, None, None]
    return jnp.where(y >= 0, y, slope[None, :, None, None] * y)


if __name__ == "__main__":
    # Small shapes consistent with the module: ConvPRelu(in_=4, out=8), x (2, 4, 16, 16).
    N, C_IN, C_OUT, H, W = 2, 4, 8, 16, 16
    key = jax.random.PRNGKey(0)
    kx, kw, kb, kg, kbe, ks = jax.random.split(key, 6)

    x = jax.random.normal(kx, (N, C_IN, H, W), dtype=jnp.float32)
    weight = 0.1 * jax.random.normal(kw, (C_OUT, C_IN, 3, 3), dtype=jnp.float32)
    bias = 0.05 * jax.random.normal(kb, (C_OUT,), dtype=jnp.float32)
    # Arbitrary (trained-like) BN/PReLU parameters; module defaults would be 1 / 0 / 0.
    gamma = 1.0 + 0.1 * jax.random.normal(kg, (C_OUT,), dtype=jnp.float32)
    beta = 0.1 * jax.random.normal(kbe, (C_OUT,), dtype=jnp.float32)
    slope = 0.2 * jax.random.normal(ks, (C_OUT,), dtype=jnp.float32)

    y_ref = _reference(x, weight, bias, gamma, beta, slope)

    # f32 operands: strict check of the conv / two-phase-BN / PReLU plumbing
    # (tile_h=8 -> 2 row blocks per image, so the cross-tile stats path is exercised).
    y_f32 = conv_prelu(x, weight, bias, gamma, beta, slope,
                       tile_h=8, compute_dtype=jnp.float32)
    y_f32 = jax.block_until_ready(y_f32)
    assert y_f32.shape == (N, C_OUT, H, W)
    assert jnp.allclose(y_f32, y_ref, rtol=1e-4, atol=1e-4), (
        float(jnp.max(jnp.abs(y_f32 - y_ref))))

    # bf16 MXU operands (default fast path): looser tolerance vs the f32 reference.
    y_bf16 = conv_prelu(x, weight, bias, gamma, beta, slope, tile_h=8)
    y_bf16 = jax.block_until_ready(y_bf16)
    assert y_bf16.shape == (N, C_OUT, H, W)
    assert jnp.allclose(y_bf16, y_ref, rtol=5e-2, atol=5e-2), (
        float(jnp.max(jnp.abs(y_bf16 - y_ref))))

    print("KERNEL_OK")
</pallas_src>

<mosaic_0001>
module attributes {stable_mosaic.version = 11 : i64} {
  func.func @_conv_stats_kernel(%arg0: i32, %arg1: i32, %arg2: memref<1x1x182x128xf32, #tpu.memory_space<vmem>>, %arg3: memref<1152x128xf32, #tpu.memory_space<vmem>>, %arg4: memref<1x1x144x128xf32, #tpu.memory_space<vmem>>, %arg5: memref<1x1x2x128xf32, #tpu.memory_space<vmem>>, %arg6: memref<144x1152xf32, #tpu.memory_space<vmem>>) attributes {dimension_semantics = [#tpu.dimension_semantics<parallel>, #tpu.dimension_semantics<parallel>], iteration_bounds = array<i64: 2, 2>, scalar_prefetch = 0 : i64, scratch_operands = 1 : i64, tpu.core_type = #tpu.core_type<tc>, window_params = [{transform_indices = @transform_0, window_bounds = array<i64: 1, 1, 182, 128>}, {pipeline_mode = #tpu.pipeline_mode<synchronous>, transform_indices = @transform_1, window_bounds = array<i64: 1152, 128>}, {transform_indices = @transform_2, window_bounds = array<i64: 1, 1, 144, 128>}, {transform_indices = @transform_3, window_bounds = array<i64: 1, 1, 2, 128>}]} {
    %c0 = arith.constant 0 : index
    %c0_0 = arith.constant 0 : index
    %c0_1 = arith.constant 0 : index
    %c0_2 = arith.constant 0 : index
    %0 = vector.load %arg2[%c0, %c0_0, %c0_1, %c0_2] : memref<1x1x182x128xf32, #tpu.memory_space<vmem>>, vector<1x1x144x128xf32>
    %1 = vector.shape_cast %0 : vector<1x1x144x128xf32> to vector<144x128xf32>
    %c0_3 = arith.constant 0 : index
    %c0_4 = arith.constant 0 : index
    %2 = vector.load %arg6[%c0_3, %c0_4] : memref<144x1152xf32, #tpu.memory_space<vmem>>, vector<144x128xf32>
    tpu.vector_store %arg6[%c0_3, %c0_4], %1 {strides = array<i32>} : memref<144x1152xf32, #tpu.memory_space<vmem>>, vector<144x128xf32>,
    %c0_5 = arith.constant 0 : index
    %c0_6 = arith.constant 0 : index
    %c1 = arith.constant 1 : index
    %c0_7 = arith.constant 0 : index
    %3 = vector.load %arg2[%c0_5, %c0_6, %c1, %c0_7] : memref<1x1x182x128xf32, #tpu.memory_space<vmem>>, vector<1x1x144x128xf32>
    %4 = vector.shape_cast %3 : vector<1x1x144x128xf32> to vector<144x128xf32>
    %c0_8 = arith.constant 0 : index
    %c128 = arith.constant 128 : index
    %5 = vector.load %arg6[%c0_8, %c128] : memref<144x1152xf32, #tpu.memory_space<vmem>>, vector<144x128xf32>
    tpu.vector_store %arg6[%c0_8, %c128], %4 {strides = array<i32>} : memref<144x1152xf32, #tpu.memory_space<vmem>>, vector<144x128xf32>,
    %c0_9 = arith.constant 0 : index
    %c0_10 = arith.constant 0 : index
    %c2 = arith.constant 2 : index
    %c0_11 = arith.constant 0 : index
    %6 = vector.load %arg2[%c0_9, %c0_10, %c2, %c0_11] : memref<1x1x182x128xf32, #tpu.memory_space<vmem>>, vector<1x1x144x128xf32>
    %7 = vector.shape_cast %6 : vector<1x1x144x128xf32> to vector<144x128xf32>
    %c0_12 = arith.constant 0 : index
    %c256 = arith.constant 256 : index
    %8 = vector.load %arg6[%c0_12, %c256] : memref<144x1152xf32, #tpu.memory_space<vmem>>, vector<144x128xf32>
    tpu.vector_store %arg6[%c0_12, %c256], %7 {strides = array<i32>} : memref<144x1152xf32, #tpu.memory_space<vmem>>, vector<144x128xf32>,
    %c0_13 = arith.constant 0 : index
    %c0_14 = arith.constant 0 : index
    %c18 = arith.constant 18 : index
    %c0_15 = arith.constant 0 : index
    %9 = vector.load %arg2[%c0_13, %c0_14, %c18, %c0_15] : memref<1x1x182x128xf32, #tpu.memory_space<vmem>>, vector<1x1x144x128xf32>
    %10 = vector.shape_cast %9 : vector<1x1x144x128xf32> to vector<144x128xf32>
    %c0_16 = arith.constant 0 : index
    %c384 = arith.constant 384 : index
    %11 = vector.load %arg6[%c0_16, %c384] : memref<144x1152xf32, #tpu.memory_space<vmem>>, vector<144x128xf32>
    tpu.vector_store %arg6[%c0_16, %c384], %10 {strides = array<i32>} : memref<144x1152xf32, #tpu.memory_space<vmem>>, vector<144x128xf32>,
    %c0_17 = arith.constant 0 : index
    %c0_18 = arith.constant 0 : index
    %c19 = arith.constant 19 : index
    %c0_19 = arith.constant 0 : index
    %12 = vector.load %arg2[%c0_17, %c0_18, %c19, %c0_19] : memref<1x1x182x128xf32, #tpu.memory_space<vmem>>, vector<1x1x144x128xf32>
    %13 = vector.shape_cast %12 : vector<1x1x144x128xf32> to vector<144x128xf32>
    %c0_20 = arith.constant 0 : index
    %c512 = arith.constant 512 : index
    %14 = vector.load %arg6[%c0_20, %c512] : memref<144x1152xf32, #tpu.memory_space<vmem>>, vector<144x128xf32>
    tpu.vector_store %arg6[%c0_20, %c512], %13 {strides = array<i32>} : memref<144x1152xf32, #tpu.memory_space<vmem>>, vector<144x128xf32>,
    %c0_21 = arith.constant 0 : index
    %c0_22 = arith.constant 0 : index
    %c20 = arith.constant 20 : index
    %c0_23 = arith.constant 0 : index
    %15 = vector.load %arg2[%c0_21, %c0_22, %c20, %c0_23] : memref<1x1x182x128xf32, #tpu.memory_space<vmem>>, vector<1x1x144x128xf32>
    %16 = vector.shape_cast %15 : vector<1x1x144x128xf32> to vector<144x128xf32>
    %c0_24 = arith.constant 0 : index
    %c640 = arith.constant 640 : index
    %17 = vector.load %arg6[%c0_24, %c640] : memref<144x1152xf32, #tpu.memory_space<vmem>>, vector<144x128xf32>
    tpu.vector_store %arg6[%c0_24, %c640], %16 {strides = array<i32>} : memref<144x1152xf32, #tpu.memory_space<vmem>>, vector<144x128xf32>,
    %c0_25 = arith.constant 0 : index
    %c0_26 = arith.constant 0 : index
    %c36 = arith.constant 36 : index
    %c0_27 = arith.constant 0 : index
    %18 = vector.load %arg2[%c0_25, %c0_26, %c36, %c0_27] : memref<1x1x182x128xf32, #tpu.memory_space<vmem>>, vector<1x1x144x128xf32>
    %19 = vector.shape_cast %18 : vector<1x1x144x128xf32> to vector<144x128xf32>
    %c0_28 = arith.constant 0 : index
    %c768 = arith.constant 768 : index
    %20 = vector.load %arg6[%c0_28, %c768] : memref<144x1152xf32, #tpu.memory_space<vmem>>, vector<144x128xf32>
    tpu.vector_store %arg6[%c0_28, %c768], %19 {strides = array<i32>} : memref<144x1152xf32, #tpu.memory_space<vmem>>, vector<144x128xf32>,
    %c0_29 = arith.constant 0 : index
    %c0_30 = arith.constant 0 : index
    %c37 = arith.constant 37 : index
    %c0_31 = arith.constant 0 : index
    %21 = vector.load %arg2[%c0_29, %c0_30, %c37, %c0_31] : memref<1x1x182x128xf32, #tpu.memory_space<vmem>>, vector<1x1x144x128xf32>
    %22 = vector.shape_cast %21 : vector<1x1x144x128xf32> to vector<144x128xf32>
    %c0_32 = arith.constant 0 : index
    %c896 = arith.constant 896 : index
    %23 = vector.load %arg6[%c0_32, %c896] : memref<144x1152xf32, #tpu.memory_space<vmem>>, vector<144x128xf32>
    tpu.vector_store %arg6[%c0_32, %c896], %22 {strides = array<i32>} : memref<144x1152xf32, #tpu.memory_space<vmem>>, vector<144x128xf32>,
    %c0_33 = arith.constant 0 : index
    %c0_34 = arith.constant 0 : index
    %c38 = arith.constant 38 : index
    %c0_35 = arith.constant 0 : index
    %24 = vector.load %arg2[%c0_33, %c0_34, %c38, %c0_35] : memref<1x1x182x128xf32, #tpu.memory_space<vmem>>, vector<1x1x144x128xf32>
    %25 = vector.shape_cast %24 : vector<1x1x144x128xf32> to vector<144x128xf32>
    %c0_36 = arith.constant 0 : index
    %c1024 = arith.constant 1024 : index
    %26 = vector.load %arg6[%c0_36, %c1024] : memref<144x1152xf32, #tpu.memory_space<vmem>>, vector<144x128xf32>
    tpu.vector_store %arg6[%c0_36, %c1024], %25 {strides = array<i32>} : memref<144x1152xf32, #tpu.memory_space<vmem>>, vector<144x128xf32>,
    %c0_37 = arith.constant 0 : index
    %c0_38 = arith.constant 0 : index
    %27 = vector.load %arg6[%c0_37, %c0_38] : memref<144x1152xf32, #tpu.memory_space<vmem>>, vector<144x1152xf32>
    %c0_39 = arith.constant 0 : index
    %c0_40 = arith.constant 0 : index
    %28 = vector.load %arg3[%c0_39, %c0_40] : memref<1152x128xf32, #tpu.memory_space<vmem>>, vector<1152x128xf32>
    %cst = arith.constant dense<0.000000e+00> : vector<144x128xf32>
    %29 = tpu.matmul %27, %28, %cst {dimension_numbers = #tpu.dot_dimension_numbers<[1], [0], [0], [1], [0, 0, 1, 1], [], []>} : vector<144x1152xf32>, vector<1152x128xf32>, vector<144x128xf32> -> vector<144x128xf32>
    %c0_41 = arith.constant 0 : index
    %c0_42 = arith.constant 0 : index
    %c0_43 = arith.constant 0 : index
    %c0_44 = arith.constant 0 : index
    %30 = vector.load %arg4[%c0_41, %c0_42, %c0_43, %c0_44] : memref<1x1x144x128xf32, #tpu.memory_space<vmem>>, vector<1x1x144x128xf32>
    %31 = vector.shape_cast %30 : vector<1x1x144x128xf32> to vector<144x128xf32>
    %32 = vector.shape_cast %29 : vector<144x128xf32> to vector<1x1x144x128xf32>
    tpu.vector_store %arg4[%c0_41, %c0_42, %c0_43, %c0_44], %32 {strides = array<i32>} : memref<1x1x144x128xf32, #tpu.memory_space<vmem>>, vector<1x1x144x128xf32>,
    %33 = tpu.iota {dimensions = array<i32: 0>} : vector<144x1xi32>
    %c18_i32 = arith.constant 18 : i32
    %c0_i32 = arith.constant 0 : i32
    %34 = arith.cmpi eq, %c18_i32, %c0_i32 : i32
    %c1_i32 = arith.constant 1 : i32
    %35 = arith.select %34, %c1_i32, %c18_i32 : i32
    %36 = vector.broadcast %35 : i32 to vector<144x1xi32>
    %37 = arith.remsi %33, %36 : vector<144x1xi32>
    %c0_i32_45 = arith.constant 0 : i32
    %38 = vector.broadcast %c0_i32_45 : i32 to vector<144x1xi32>
    %39 = arith.cmpi ne, %37, %38 : vector<144x1xi32>
    %c0_i32_46 = arith.constant 0 : i32
    %40 = vector.broadcast %c0_i32_46 : i32 to vector<144x1xi32>
    %41 = arith.cmpi slt, %37, %40 : vector<144x1xi32>
    %c0_i32_47 = arith.constant 0 : i32
    %42 = arith.cmpi slt, %35, %c0_i32_47 : i32
    %43 = vector.broadcast %42 : i1 to vector<144x1xi1>
    %44 = vector.broadcast %43 : vector<144x1xi1> to vector<144x1xi1>
    %45 = arith.xori %41, %44 : vector<144x1xi1>
    %46 = arith.andi %45, %39 : vector<144x1xi1>
    %47 = vector.broadcast %35 : i32 to vector<144x1xi32>
    %48 = arith.addi %37, %47 : vector<144x1xi32>
    %49 = arith.select %46, %48, %37 : vector<144x1xi1>, vector<144x1xi32>
    %c16_i32 = arith.constant 16 : i32
    %50 = vector.broadcast %c16_i32 : i32 to vector<144x1xi32>
    %51 = arith.cmpi slt, %49, %50 : vector<144x1xi32>
    %52 = arith.extui %51 : vector<144x1xi1> to vector<144x1xi32>
    %53 = arith.sitofp %52 : vector<144x1xi32> to vector<144x1xf32>
    %54 = vector.broadcast %53 : vector<144x1xf32> to vector<144x128xf32>
    %55 = arith.mulf %29, %54 : vector<144x128xf32>
    %cst_48 = arith.constant dense<0.000000e+00> : vector<128xf32>
    %56 = vector.multi_reduction <add>, %55, %cst_48 [0] : vector<144x128xf32> to vector<128xf32>
    %57 = vector.shape_cast %56 : vector<128xf32> to vector<1x128xf32>
    %c0_49 = arith.constant 0 : index
    %c0_50 = arith.constant 0 : index
    %c0_51 = arith.constant 0 : index
    %c0_52 = arith.constant 0 : index
    %58 = vector.load %arg5[%c0_49, %c0_50, %c0_51, %c0_52] : memref<1x1x2x128xf32, #tpu.memory_space<vmem>>, vector<1x1x1x128xf32>
    %59 = vector.shape_cast %58 : vector<1x1x1x128xf32> to vector<1x128xf32>
    %60 = vector.shape_cast %57 : vector<1x128xf32> to vector<1x1x1x128xf32>
    tpu.vector_store %arg5[%c0_49, %c0_50, %c0_51, %c0_52], %60 {strides = array<i32>} : memref<1x1x2x128xf32, #tpu.memory_space<vmem>>, vector<1x1x1x128xf32>,
    %61 = arith.mulf %29, %29 : vector<144x128xf32>
    %62 = vector.broadcast %53 : vector<144x1xf32> to vector<144x128xf32>
    %63 = arith.mulf %61, %62 : vector<144x128xf32>
    %cst_53 = arith.constant dense<0.000000e+00> : vector<128xf32>
    %64 = vector.multi_reduction <add>, %63, %cst_53 [0] : vector<144x128xf32> to vector<128xf32>
    %65 = vector.shape_cast %64 : vector<128xf32> to vector<1x128xf32>
    %c0_54 = arith.constant 0 : index
    %c0_55 = arith.constant 0 : index
    %c1_56 = arith.constant 1 : index
    %c0_57 = arith.constant 0 : index
    %66 = vector.load %arg5[%c0_54, %c0_55, %c1_56, %c0_57] : memref<1x1x2x128xf32, #tpu.memory_space<vmem>>, vector<1x1x1x128xf32>
    %67 = vector.shape_cast %66 : vector<1x1x1x128xf32> to vector<1x128xf32>
    %68 = vector.shape_cast %65 : vector<1x128xf32> to vector<1x1x1x128xf32>
    tpu.vector_store %arg5[%c0_54, %c0_55, %c1_56, %c0_57], %68 {strides = array<i32>} : memref<1x1x2x128xf32, #tpu.memory_space<vmem>>, vector<1x1x1x128xf32>,
    return
  }
  func.func @transform_0(%arg0: i32, %arg1: i32) -> (i32, i32, i32, i32) {
    %c0_i32 = arith.constant 0 : i32
    %c0_i32_0 = arith.constant 0 : i32
    %c0_i32_1 = arith.constant 0 : i32
    return %arg0, %arg1, %c0_i32, %c0_i32_0 : i32, i32, i32, i32
  }
  func.func @transform_1(%arg0: i32, %arg1: i32) -> (i32, i32) {
    %c0_i32 = arith.constant 0 : i32
    %c0_i32_0 = arith.constant 0 : i32
    %c0_i32_1 = arith.constant 0 : i32
    return %c0_i32, %c0_i32_0 : i32, i32
  }
  func.func @transform_2(%arg0: i32, %arg1: i32) -> (i32, i32, i32, i32) {
    %c0_i32 = arith.constant 0 : i32
    %c0_i32_0 = arith.constant 0 : i32
    %c0_i32_1 = arith.constant 0 : i32
    return %arg0, %arg1, %c0_i32, %c0_i32_0 : i32, i32, i32, i32
  }
  func.func @transform_3(%arg0: i32, %arg1: i32) -> (i32, i32, i32, i32) {
    %c0_i32 = arith.constant 0 : i32
    %c0_i32_0 = arith.constant 0 : i32
    %c0_i32_1 = arith.constant 0 : i32
    return %arg0, %arg1, %c0_i32, %c0_i32_0 : i32, i32, i32, i32
  }
}

module attributes {stable_mosaic.version = 11 : i64} {
  func.func @_bn_prelu_kernel(%arg0: i32, %arg1: i32, %arg2: memref<1x1x144x128xf32, #tpu.memory_space<vmem>>, %arg3: memref<1x128xf32, #tpu.memory_space<vmem>>, %arg4: memref<1x128xf32, #tpu.memory_space<vmem>>, %arg5: memref<1x128xf32, #tpu.memory_space<vmem>>, %arg6: memref<1x1x144x128xf32, #tpu.memory_space<vmem>>) attributes {dimension_semantics = [#tpu.dimension_semantics<parallel>, #tpu.dimension_semantics<parallel>], iteration_bounds = array<i64: 2, 2>, scalar_prefetch = 0 : i64, scratch_operands = 0 : i64, tpu.core_type = #tpu.core_type<tc>, window_params = [{transform_indices = @transform_0, window_bounds = array<i64: 1, 1, 144, 128>}, {pipeline_mode = #tpu.pipeline_mode<synchronous>, transform_indices = @transform_1, window_bounds = array<i64: 1, 128>}, {pipeline_mode = #tpu.pipeline_mode<synchronous>, transform_indices = @transform_2, window_bounds = array<i64: 1, 128>}, {pipeline_mode = #tpu.pipeline_mode<synchronous>, transform_indices = @transform_3, window_bounds = array<i64: 1, 128>}, {transform_indices = @transform_4, window_bounds = array<i64: 1, 1, 144, 128>}]} {
    %c0 = arith.constant 0 : index
    %c0_0 = arith.constant 0 : index
    %c0_1 = arith.constant 0 : index
    %c0_2 = arith.constant 0 : index
    %0 = vector.load %arg2[%c0, %c0_0, %c0_1, %c0_2] : memref<1x1x144x128xf32, #tpu.memory_space<vmem>>, vector<1x1x144x128xf32>
    %1 = vector.shape_cast %0 : vector<1x1x144x128xf32> to vector<144x128xf32>
    %c0_3 = arith.constant 0 : index
    %c0_4 = arith.constant 0 : index
    %2 = vector.load %arg3[%c0_3, %c0_4] : memref<1x128xf32, #tpu.memory_space<vmem>>, vector<1x128xf32>
    %3 = vector.broadcast %2 : vector<1x128xf32> to vector<144x128xf32>
    %4 = arith.mulf %1, %3 : vector<144x128xf32>
    %c0_5 = arith.constant 0 : index
    %c0_6 = arith.constant 0 : index
    %5 = vector.load %arg4[%c0_5, %c0_6] : memref<1x128xf32, #tpu.memory_space<vmem>>, vector<1x128xf32>
    %6 = vector.broadcast %5 : vector<1x128xf32> to vector<144x128xf32>
    %7 = arith.addf %4, %6 : vector<144x128xf32>
    %cst = arith.constant 0.000000e+00 : f32
    %8 = vector.broadcast %cst : f32 to vector<144x128xf32>
    %9 = arith.cmpf oge, %7, %8 : vector<144x128xf32>
    %c0_7 = arith.constant 0 : index
    %c0_8 = arith.constant 0 : index
    %10 = vector.load %arg5[%c0_7, %c0_8] : memref<1x128xf32, #tpu.memory_space<vmem>>, vector<1x128xf32>
    %11 = vector.broadcast %10 : vector<1x128xf32> to vector<144x128xf32>
    %12 = arith.mulf %11, %7 : vector<144x128xf32>
    %13 = arith.select %9, %7, %12 : vector<144x128xi1>, vector<144x128xf32>
    %c0_9 = arith.constant 0 : index
    %c0_10 = arith.constant 0 : index
    %c0_11 = arith.constant 0 : index
    %c0_12 = arith.constant 0 : index
    %14 = vector.load %arg6[%c0_9, %c0_10, %c0_11, %c0_12] : memref<1x1x144x128xf32, #tpu.memory_space<vmem>>, vector<1x1x144x128xf32>
    %15 = vector.shape_cast %14 : vector<1x1x144x128xf32> to vector<144x128xf32>
    %16 = vector.shape_cast %13 : vector<144x128xf32> to vector<1x1x144x128xf32>
    tpu.vector_store %arg6[%c0_9, %c0_10, %c0_11, %c0_12], %16 {strides = array<i32>} : memref<1x1x144x128xf32, #tpu.memory_space<vmem>>, vector<1x1x144x128xf32>,
    return
  }
  func.func @transform_0(%arg0: i32, %arg1: i32) -> (i32, i32, i32, i32) {
    %c0_i32 = arith.constant 0 : i32
    %c0_i32_0 = arith.constant 0 : i32
    %c0_i32_1 = arith.constant 0 : i32
    return %arg0, %arg1, %c0_i32, %c0_i32_0 : i32, i32, i32, i32
  }
  func.func @transform_1(%arg0: i32, %arg1: i32) -> (i32, i32) {
    %c0_i32 = arith.constant 0 : i32
    %c0_i32_0 = arith.constant 0 : i32
    %c0_i32_1 = arith.constant 0 : i32
    return %c0_i32, %c0_i32_0 : i32, i32
  }
  func.func @transform_2(%arg0: i32, %arg1: i32) -> (i32, i32) {
    %c0_i32 = arith.constant 0 : i32
    %c0_i32_0 = arith.constant 0 : i32
    %c0_i32_1 = arith.constant 0 : i32
    return %c0_i32, %c0_i32_0 : i32, i32
  }
  func.func @transform_3(%arg0: i32, %arg1: i32) -> (i32, i32) {
    %c0_i32 = arith.constant 0 : i32
    %c0_i32_0 = arith.constant 0 : i32
    %c0_i32_1 = arith.constant 0 : i32
    return %c0_i32, %c0_i32_0 : i32, i32
  }
  func.func @transform_4(%arg0: i32, %arg1: i32) -> (i32, i32, i32, i32) {
    %c0_i32 = arith.constant 0 : i32
    %c0_i32_0 = arith.constant 0 : i32
    %c0_i32_1 = arith.constant 0 : i32
    return %arg0, %arg1, %c0_i32, %c0_i32_0 : i32, i32, i32, i32
  }
}

</mosaic_0001>

<bundles_post_ra>
// kernel: conv_prelu.3
= control target key start
LH: loop header
LB: loop body
LE: loop exit
PB: predicated region body
PF: predicated region fallthrough
CT: control target
= control target key end

     0   :  { %s595_s15 = smov 0   ;;  %s597_s16 = smov 0   ;;  %s758_s0 = inlined_call_operand.vmem [shape: f32[2,2,144,128], index: 0, kind: input, shape index: {}]   ;;  %s759_s1 = inlined_call_operand.vmem [shape: f32[1,128], index: 1, kind: input, shape index: {}]   ;;  %s760_s2 = inlined_call_operand.vmem [shape: f32[1,128], index: 2, kind: input, shape index: {}]   ;;  %s761_s3 = inlined_call_operand.vmem [shape: f32[1,128], index: 3, kind: input, shape index: {}]   ;;  %s762_s4 = inlined_call_operand.vmem [shape: f32[2,2,144,128], index: 4, kind: output, shape index: {}]  }
   0x1   :  { %s599_s17 = smov 0   ;;  %s601_s18 = smov 0  }
   0x2   :  { %s603_s19 = smov 0  }
   0x3 LB: > { %s23_s20 = sadd.s32 1, %s560_s17  ;;  %s26_s21 = sadd.s32 1, %s564_s18  ;;  %s568_s19 = sphi %s603_s19, %s14_s19   ;;  %s564_s18 = sphi %s601_s18, %s766_s18   ;;  %s560_s17 = sphi %s599_s17, %s765_s17   ;;  %s556_s16 = sphi %s597_s16, %s764_s16   ;;  %s552_s15 = sphi %s595_s15, %s763_s15  }
   0x4   : > { %p24_p0 = scmp.ge.s32.totalorder %s23_s20, 2  ;;  %p480_p1 = scmp.ge.s32.totalorder %s568_s19, 1 }
   0x5   : > { %p182_p2 = scmp.lt.s32.totalorder %s568_s19, 5 }
   0x6   : > { %s768_s20 = smov (%p24_p0, %s23_s20), 0  ;;  %s770_s21 = smov (!%p24_p0, %s26_s21), %s564_s18 }
   0x7   : > { %p183_p3 = pnand %p480_p1, %p182_p2  ;;  %p28_p4 = scmp.ge.s32.totalorder %s770_s21, 2 }
   0x8   : > { %p216_p5 = scmp.lt.s32.totalorder (!%p183_p3), %s556_s16, 1  ;;  %p218_p6 = scmp.lt.s32.totalorder (!%p183_p3), %s552_s15, 1  ;;  %v631_v0 = vld [vmem:[%s759_s1] ss:$0 sm:$0xff] (!%p183_p3) }
   0x9   : > { %s772_s21 = smov (%p28_p4, %s770_s21), 0  ;;  %186 = sbr.rel (%p183_p3) target bundleno = 52 (0x34), region = 36 }
   0xa   : > { %v641_v1 = vld [vmem:[%s760_s2] ss:$0 sm:$0xff] (!%p183_p3) }
   0xb   : > { %v655_v11 = vld [vmem:[%s761_s3] ss:$0 sm:$0xff] (!%p183_p3) }
  0x10   : > { %s774_s16 = smov (!%p216_p5, %s556_s16), 1  ;;  %s776_s15 = smov (!%p218_p6, %s552_s15), 1 }
  0x11   : > { %s489_s22 = smul.u32 36, %s774_s16 }
  0x12   : > { %s488_s23 = smul.u32 18, %s776_s15 }
  0x14   : > { %s625_s24 = sadd.s32 %s489_s22, %s488_s23 }
  0x15   : > { %s481_s25 = sshll.u32 %s625_s24, 3 }
  0x16   : > { %s636_s30 = scalar_lea.vmem %s758_s0, %s481_s25  ;;  %s673_s11 = scalar_lea.vmem %s762_s4, %s481_s25 }
  0x17   : > { %v234_v2 = vld [vmem:[%s636_s30] sm:$0xff]  ;;  %v235_v3 = vld [vmem:[%s636_s30 + $0x8] sm:$0xff]  ;;  %v236_v4 = vld [vmem:[%s636_s30 + $0x10] sm:$0xff] }
  0x18   : > { %v259_v5 = vmul.f32 %v631_v0, %v234_v2  ;;  %v260_v6 = vmul.f32 %v631_v0, %v235_v3  ;;  %v261_v7 = vmul.f32 %v631_v0, %v236_v4  ;;  %v237_v8 = vld [vmem:[%s636_s30 + $0x18] sm:$0xff]  ;;  %v238_v9 = vld [vmem:[%s636_s30 + $0x20] sm:$0xff]  ;;  %v239_v10 = vld [vmem:[%s636_s30 + $0x28] sm:$0xff] }
  0x19   : > { %v262_v12 = vmul.f32 %v631_v0, %v237_v8  ;;  %v263_v13 = vmul.f32 %v631_v0, %v238_v9  ;;  %v264_v14 = vmul.f32 %v631_v0, %v239_v10  ;;  %v240_v15 = vld [vmem:[%s636_s30 + $0x30] sm:$0xff]  ;;  %v241_v16 = vld [vmem:[%s636_s30 + $0x38] sm:$0xff]  ;;  %v242_v29 = vld [vmem:[%s636_s30 + $0x40] sm:$0xff] }
  0x1a   : > { %v284_v17 = vadd.f32 %v641_v1, %v259_v5  ;;  %v285_v18 = vadd.f32 %v641_v1, %v260_v6  ;;  %v286_v19 = vadd.f32 %v641_v1, %v261_v7  ;;  %v265_v20 = vmul.f32 %v631_v0, %v240_v15  ;;  %v243_v33 = vld [vmem:[%s636_s30 + $0x48] sm:$0xff]  ;;  %v244_v34 = vld [vmem:[%s636_s30 + $0x50] sm:$0xff]  ;;  %v245_v35 = vld [vmem:[%s636_s30 + $0x58] sm:$0xff] }
  0x1b   : > { %v287_v21 = vadd.f32 %v641_v1, %v262_v12  ;;  %v288_v22 = vadd.f32 %v641_v1, %v263_v13  ;;  %v289_v23 = vadd.f32 %v641_v1, %v264_v14  ;;  %v266_v24 = vmul.f32 %v631_v0, %v241_v16  ;;  %v246_v47 = vld [vmem:[%s636_s30 + $0x60] sm:$0xff]  ;;  %v247_v48 = vld [vmem:[%s636_s30 + $0x68] sm:$0xff]  ;;  %v248_v61 = vld [vmem:[%s636_s30 + $0x70] sm:$0xff] }
  0x1c   : > { %vm302_vm0 = vcmp.ge.f32.partialorder %v284_v17, 0.0  ;;  %v327_v25 = vmul.f32 %v655_v11, %v284_v17  ;;  %vm303_vm1 = vcmp.ge.f32.partialorder %v285_v18, 0.0  ;;  %v328_v26 = vmul.f32 %v655_v11, %v285_v18  ;;  %v249_v62 = vld [vmem:[%s636_s30 + $0x78] sm:$0xff]  ;;  %v250_v7 = vld [vmem:[%s636_s30 + $0x80] sm:$0xff]  ;;  %v251_v8 = vld [vmem:[%s636_s30 + $0x88] sm:$0xff] }
  0x1d   : > { %vm304_vm2 = vcmp.ge.f32.partialorder %v286_v19, 0.0  ;;  %v329_v27 = vmul.f32 %v655_v11, %v286_v19  ;;  %vm305_vm3 = vcmp.ge.f32.partialorder %v287_v21, 0.0  ;;  %v330_v28 = vmul.f32 %v655_v11, %v287_v21 }
  0x1e   : > { %v345_v30 = vsel %vm302_vm0, %v284_v17, %v327_v25  ;;  %v346_v31 = vsel %vm303_vm1, %v285_v18, %v328_v26  ;;  %vm306_vm4 = vcmp.ge.f32.partialorder %v288_v22, 0.0  ;;  %v331_v32 = vmul.f32 %v655_v11, %v288_v22 }
  0x1f   : > { %363 = vst [vmem:[%s673_s11] sm:$0xff] %v345_v30  ;;  %364 = vst [vmem:[%s673_s11 + $0x8] sm:$0xff] %v346_v31  ;;  %v347_v36 = vsel %vm304_vm2, %v286_v19, %v329_v27  ;;  %v348_v37 = vsel %vm305_vm3, %v287_v21, %v330_v28  ;;  %vm307_vm5 = vcmp.ge.f32.partialorder %v289_v23, 0.0  ;;  %v332_v38 = vmul.f32 %v655_v11, %v289_v23 }
  0x20   : > { %365 = vst [vmem:[%s673_s11 + $0x10] sm:$0xff] %v347_v36  ;;  %366 = vst [vmem:[%s673_s11 + $0x18] sm:$0xff] %v348_v37  ;;  %v349_v39 = vsel %vm306_vm4, %v288_v22, %v331_v32  ;;  %v290_v40 = vadd.f32 %v641_v1, %v265_v20  ;;  %v291_v41 = vadd.f32 %v641_v1, %v266_v24 }
  0x21   : > { %v267_v42 = vmul.f32 %v631_v0, %v242_v29  ;;  %367 = vst [vmem:[%s673_s11 + $0x20] sm:$0xff] %v349_v39  ;;  %v350_v43 = vsel %vm307_vm5, %v289_v23, %v332_v38  ;;  %v268_v44 = vmul.f32 %v631_v0, %v243_v33  ;;  %v269_v45 = vmul.f32 %v631_v0, %v244_v34 }
  0x22   : > { %v270_v46 = vmul.f32 %v631_v0, %v245_v35  ;;  %368 = vst [vmem:[%s673_s11 + $0x28] sm:$0xff] %v350_v43  ;;  %vm308_vm6 = vcmp.ge.f32.partialorder %v290_v40, 0.0  ;;  %v333_v49 = vmul.f32 %v655_v11, %v290_v40  ;;  %vm309_vm7 = vcmp.ge.f32.partialorder %v291_v41, 0.0 }
  0x23   : > { %v334_v50 = vmul.f32 %v655_v11, %v291_v41  ;;  %v292_v51 = vadd.f32 %v641_v1, %v267_v42  ;;  %v293_v52 = vadd.f32 %v641_v1, %v268_v44  ;;  %v294_v53 = vadd.f32 %v641_v1, %v269_v45 }
  0x24   : > { %v295_v54 = vadd.f32 %v641_v1, %v270_v46  ;;  %v351_v55 = vsel %vm308_vm6, %v290_v40, %v333_v49  ;;  %v271_v57 = vmul.f32 %v631_v0, %v246_v47  ;;  %v272_v58 = vmul.f32 %v631_v0, %v247_v48 }
  0x25   : > { %v352_v56 = vsel %vm309_vm7, %v291_v41, %v334_v50  ;;  %369 = vst [vmem:[%s673_s11 + $0x30] sm:$0xff] %v351_v55  ;;  %vm310_vm8 = vcmp.ge.f32.partialorder %v292_v51, 0.0  ;;  %v335_v59 = vmul.f32 %v655_v11, %v292_v51  ;;  %vm311_vm9 = vcmp.ge.f32.partialorder %v293_v52, 0.0 }
  0x26   : > { %370 = vst [vmem:[%s673_s11 + $0x38] sm:$0xff] %v352_v56  ;;  %v336_v60 = vmul.f32 %v655_v11, %v293_v52  ;;  %vm312_vm10 = vcmp.ge.f32.partialorder %v294_v53, 0.0  ;;  %v337_v63 = vmul.f32 %v655_v11, %v294_v53  ;;  %vm313_vm11 = vcmp.ge.f32.partialorder %v295_v54, 0.0 }
  0x27   : > { %v338_v2 = vmul.f32 %v655_v11, %v295_v54  ;;  %v353_v3 = vsel %vm310_vm8, %v292_v51, %v335_v59  ;;  %v296_v5 = vadd.f32 %v641_v1, %v271_v57  ;;  %v297_v6 = vadd.f32 %v641_v1, %v272_v58 }
  0x28   : > { %v354_v4 = vsel %vm311_vm9, %v293_v52, %v336_v60  ;;  %371 = vst [vmem:[%s673_s11 + $0x40] sm:$0xff] %v353_v3  ;;  %v355_v9 = vsel %vm312_vm10, %v294_v53, %v337_v63  ;;  %v273_v12 = vmul.f32 %v631_v0, %v248_v61  ;;  %v274_v13 = vmul.f32 %v631_v0, %v249_v62 }
  0x29   : > { %372 = vst [vmem:[%s673_s11 + $0x48] sm:$0xff] %v354_v4  ;;  %v356_v10 = vsel %vm313_vm11, %v295_v54, %v338_v2  ;;  %373 = vst [vmem:[%s673_s11 + $0x50] sm:$0xff] %v355_v9  ;;  %vm314_vm12 = vcmp.ge.f32.partialorder %v296_v5, 0.0  ;;  %v339_v14 = vmul.f32 %v655_v11, %v296_v5  ;;  %vm315_vm13 = vcmp.ge.f32.partialorder %v297_v6, 0.0 }
  0x2a   : > { %374 = vst [vmem:[%s673_s11 + $0x58] sm:$0xff] %v356_v10  ;;  %v340_v15 = vmul.f32 %v655_v11, %v297_v6  ;;  %v298_v16 = vadd.f32 %v641_v1, %v273_v12  ;;  %v299_v17 = vadd.f32 %v641_v1, %v274_v13  ;;  %v275_v18 = vmul.f32 %v631_v0, %v250_v7 }
  0x2b   : > { %v276_v19 = vmul.f32 %v631_v0, %v251_v8  ;;  %v357_v20 = vsel %vm314_vm12, %v296_v5, %v339_v14 }
  0x2c   : > { %v358_v21 = vsel %vm315_vm13, %v297_v6, %v340_v15  ;;  %375 = vst [vmem:[%s673_s11 + $0x60] sm:$0xff] %v357_v20  ;;  %vm316_vm14 = vcmp.ge.f32.partialorder %v298_v16, 0.0  ;;  %v341_v22 = vmul.f32 %v655_v11, %v298_v16  ;;  %vm317_vm15 = vcmp.ge.f32.partialorder %v299_v17, 0.0 }
  0x2d   : > { %376 = vst [vmem:[%s673_s11 + $0x68] sm:$0xff] %v358_v21  ;;  %v342_v23 = vmul.f32 %v655_v11, %v299_v17  ;;  %v300_v24 = vadd.f32 %v641_v1, %v275_v18  ;;  %v301_v25 = vadd.f32 %v641_v1, %v276_v19 }
  0x2e   : > { %v359_v26 = vsel %vm316_vm14, %v298_v16, %v341_v22 }
  0x2f   : > { %v360_v27 = vsel %vm317_vm15, %v299_v17, %v342_v23  ;;  %377 = vst [vmem:[%s673_s11 + $0x70] sm:$0xff] %v359_v26  ;;  %vm318_vm0 = vcmp.ge.f32.partialorder %v300_v24, 0.0  ;;  %v343_v0 = vmul.f32 %v655_v11, %v300_v24  ;;  %vm319_vm1 = vcmp.ge.f32.partialorder %v301_v25, 0.0 }
  0x30   : > { %378 = vst [vmem:[%s673_s11 + $0x78] sm:$0xff] %v360_v27  ;;  %v344_v28 = vmul.f32 %v655_v11, %v301_v25 }
  0x31   : > { %v361_v29 = vsel %vm318_vm0, %v300_v24, %v343_v0 }
  0x32   : > { %v362_v30 = vsel %vm319_vm1, %v301_v25, %v344_v28  ;;  %379 = vst [vmem:[%s673_s11 + $0x80] sm:$0xff] %v361_v29 }
  0x33   : > { %380 = vst [vmem:[%s673_s11 + $0x88] sm:$0xff] %v362_v30 }
  0x34 PF: > { %s14_s19 = sadd.s32 1, %s568_s19   ;;  %s763_s15 = smov %s560_s17 }
  0x35   : > { %p11_p7 = scmp.ge.s32.totalorder %s14_s19, 6   ;;  %s764_s16 = smov %s564_s18 }
  0x36   : > { %s765_s17 = smov %s768_s20  ;;  %s766_s18 = smov %s772_s21 }
  0x37   :  { %13 = sbr.rel (!%p11_p7) target bundleno = 3 (0x3), region = 66 }

// kernel: conv_prelu.2
= control target key start
LH: loop header
LB: loop body
LE: loop exit
PB: predicated region body
PF: predicated region fallthrough
CT: control target
= control target key end

     0   :  { %s2855_s12 = smov 0   ;;  %s2857_s13 = smov 0   ;;  %s4463_s0 = inlined_call_operand.vmem [shape: f32[2,2,182,128], index: 0, kind: input, shape index: {}]   ;;  %s4464_s1 = inlined_call_operand.vmem [shape: f32[1152,128], index: 1, kind: input, shape index: {}]   ;;  %s4465_s2 = inlined_call_operand.vmem [shape: f32[2,2,144,128], index: 2, kind: output, shape index: {0}]   ;;  %s4466_s3 = inlined_call_operand.vmem [shape: f32[2,2,2,128], index: 3, kind: output, shape index: {1}]  }
   0x1   :  { %s2859_s14 = smov 0   ;;  %s2861_s15 = smov 0  }
   0x2   :  { %s2863_s16 = smov 0  }
   0x3 LB: > { %s23_s17 = sadd.s32 1, %s2823_s14  ;;  %s26_s18 = sadd.s32 1, %s2827_s15  ;;  %s2831_s16 = sphi %s2863_s16, %s14_s16   ;;  %s2827_s15 = sphi %s2861_s15, %s4534_s15   ;;  %s2823_s14 = sphi %s2859_s14, %s4533_s14   ;;  %s2819_s13 = sphi %s2857_s13, %s4532_s13   ;;  %s2815_s12 = sphi %s2855_s12, %s4531_s12  }
   0x4   : > { %p24_p0 = scmp.ge.s32.totalorder %s23_s17, 2  ;;  %p2260_p1 = scmp.ge.s32.totalorder %s2831_s16, 1 }
   0x5   : > { %p162_p2 = scmp.lt.s32.totalorder %s2831_s16, 5 }
   0x6   : > { %s4536_s17 = smov (%p24_p0, %s23_s17), 0  ;;  %s4538_s18 = smov (!%p24_p0, %s26_s18), %s2827_s15 }
   0x7   : > { %p163_p3 = pnand %p2260_p1, %p162_p2  ;;  %p28_p4 = scmp.ge.s32.totalorder %s4538_s18, 2 }
   0x8   : > { %v714_v0 = vld [vmem:[%s4464_s1] sm:$0xff] (!%p163_p3)  ;;  %v715_v1 = vld [vmem:[%s4464_s1 + $0x8] sm:$0xff] (!%p163_p3)  ;;  %p202_p5 = scmp.lt.s32.totalorder (!%p163_p3), %s2819_s13, 1  ;;  %p204_p6 = scmp.lt.s32.totalorder (!%p163_p3), %s2815_s12, 1  ;;  %v2833_v3 = vmov (!%p163_p3), 0.0|0.0   ;;  %v716_v6 = vld [vmem:[%s4464_s1 + $0x10] sm:$0xff] (!%p163_p3) }
   0x9   : > { %s4540_s18 = smov (%p28_p4, %s4538_s18), 0  ;;  %166 = sbr.rel (%p163_p3) target bundleno = 497 (0x1f1), region = 28 }
   0xa   : > { %v746_v2 = vld [vmem:[%s4464_s1 + $0x100] sm:$0xff] (!%p163_p3)  ;;  %2378 = vmatprep.subr.bf16.mxu1 (!%p163_p3), %v2833_v3  ;;  %2426 = vmatprep.subr.bf16.mxu0 (!%p163_p3), %v2833_v3  ;;  %v2379_v4 = vpack.c.bf16 (!%p163_p3), %v715_v1, %v714_v0  ;;  %v747_v5 = vld [vmem:[%s4464_s1 + $0x108] sm:$0xff] (!%p163_p3)  ;;  %v717_v7 = vld [vmem:[%s4464_s1 + $0x18] sm:$0xff] (!%p163_p3) }
   0xb   : > { %v2427_v8 = vpack.c.bf16 (!%p163_p3), %v747_v5, %v746_v2  ;;  %v748_v9 = vld [vmem:[%s4464_s1 + $0x110] sm:$0xff] (!%p163_p3)  ;;  %v749_v10 = vld [vmem:[%s4464_s1 + $0x118] sm:$0xff] (!%p163_p3)  ;;  %v2382_v11 = vpack.c.bf16 (!%p163_p3), %v717_v7, %v716_v6  ;;  %v718_v13 = vld [vmem:[%s4464_s1 + $0x20] sm:$0xff] (!%p163_p3) }
   0xc   : > { %2380 = vmatpush1.bf16.msra.mxu1 (!%p163_p3), %v2379_v4  ;;  %v2430_v12 = vpack.c.bf16 (!%p163_p3), %v749_v10, %v748_v9  ;;  %v719_v14 = vld [vmem:[%s4464_s1 + $0x28] sm:$0xff] (!%p163_p3)  ;;  %v750_v15 = vld [vmem:[%s4464_s1 + $0x120] sm:$0xff] (!%p163_p3)  ;;  %v720_v19 = vld [vmem:[%s4464_s1 + $0x30] sm:$0xff] (!%p163_p3) }
   0xd   : > { %2428 = vmatpush1.bf16.msra.mxu0 (!%p163_p3), %v2427_v8  ;;  %2381 = vmatprep.subr.bf16.mxu1 (!%p163_p3), %v2833_v3  ;;  %v751_v16 = vld [vmem:[%s4464_s1 + $0x128] sm:$0xff] (!%p163_p3)  ;;  %v2385_v17 = vpack.c.bf16 (!%p163_p3), %v719_v14, %v718_v13  ;;  %v721_v20 = vld [vmem:[%s4464_s1 + $0x38] sm:$0xff] (!%p163_p3)  ;;  %v752_v21 = vld [vmem:[%s4464_s1 + $0x130] sm:$0xff] (!%p163_p3) }
   0xe   : > { %2429 = vmatprep.subr.bf16.mxu0 (!%p163_p3), %v2833_v3  ;;  %v2433_v18 = vpack.c.bf16 (!%p163_p3), %v751_v16, %v750_v15  ;;  %v753_v22 = vld [vmem:[%s4464_s1 + $0x138] sm:$0xff] (!%p163_p3)  ;;  %v2388_v23 = vpack.c.bf16 (!%p163_p3), %v721_v20, %v720_v19  ;;  %v722_v25 = vld [vmem:[%s4464_s1 + $0x40] sm:$0xff] (!%p163_p3)  ;;  %v723_v26 = vld [vmem:[%s4464_s1 + $0x48] sm:$0xff] (!%p163_p3) }
   0xf   : > { %v2436_v24 = vpack.c.bf16 (!%p163_p3), %v753_v22, %v752_v21  ;;  %v754_v27 = vld [vmem:[%s4464_s1 + $0x140] sm:$0xff] (!%p163_p3)  ;;  %v755_v28 = vld [vmem:[%s4464_s1 + $0x148] sm:$0xff] (!%p163_p3)  ;;  %v2391_v29 = vpack.c.bf16 (!%p163_p3), %v723_v26, %v722_v25  ;;  %v724_v31 = vld [vmem:[%s4464_s1 + $0x50] sm:$0xff] (!%p163_p3) }
  0x10   : > { %s4542_s13 = smov (!%p202_p5, %s2819_s13), 1  ;;  %s4544_s12 = smov (!%p204_p6, %s2815_s12), 1  ;;  %2383 = vmatpush1.bf16.msra.mxu1 %v2382_v11  ;;  %v2439_v30 = vpack.c.bf16 %v755_v28, %v754_v27  ;;  %v725_v32 = vld [vmem:[%s4464_s1 + $0x58] sm:$0xff]  ;;  %v756_v33 = vld [vmem:[%s4464_s1 + $0x150] sm:$0xff]  ;;  %v726_v37 = vld [vmem:[%s4464_s1 + $0x60] sm:$0xff] }
  0x11   : > { %s2712_s23 = smul.u32 46, %s4542_s13  ;;  %2431 = vmatpush1.bf16.msra.mxu0 %v2430_v12  ;;  %2384 = vmatprep.subr.bf16.mxu1 %v2833_v3  ;;  %v757_v34 = vld [vmem:[%s4464_s1 + $0x158] sm:$0xff]  ;;  %v2394_v35 = vpack.c.bf16 %v725_v32, %v724_v31  ;;  %v727_v38 = vld [vmem:[%s4464_s1 + $0x68] sm:$0xff]  ;;  %v758_v39 = vld [vmem:[%s4464_s1 + $0x160] sm:$0xff]  ;;  %s2263_s5 = sshll.u32 %s4542_s13, 1 }
  0x12   : > { %s2711_s28 = smul.u32 23, %s4544_s12  ;;  %2432 = vmatprep.subr.bf16.mxu0 %v2833_v3  ;;  %v2442_v36 = vpack.c.bf16 %v757_v34, %v756_v33  ;;  %v759_v40 = vld [vmem:[%s4464_s1 + $0x168] sm:$0xff]  ;;  %v2397_v43 = vpack.c.bf16 %v727_v38, %v726_v37  ;;  %v728_v45 = vld [vmem:[%s4464_s1 + $0x70] sm:$0xff]  ;;  %v729_v46 = vld [vmem:[%s4464_s1 + $0x78] sm:$0xff]  ;;  %s225_s7 = sadd.s32 %s2263_s5, %s4544_s12 }
  0x13   : > { %v2445_v44 = vpack.c.bf16 %v759_v40, %v758_v39  ;;  %v760_v47 = vld [vmem:[%s4464_s1 + $0x170] sm:$0xff]  ;;  %v761_v48 = vld [vmem:[%s4464_s1 + $0x178] sm:$0xff]  ;;  %v2400_v49 = vpack.c.bf16 %v729_v46, %v728_v45  ;;  %v730_v51 = vld [vmem:[%s4464_s1 + $0x80] sm:$0xff]  ;;  %s2714_s26 = smul.u32 36, %s4542_s13  ;;  %s2264_s8 = sshll.u32 %s225_s7, 1 }
  0x14   : > { %2386 = vmatpush1.bf16.msra.mxu1 %v2385_v17  ;;  %s208_s10 = sadd.s32 %s2712_s23, %s2711_s28  ;;  %v2448_v50 = vpack.c.bf16 %v761_v48, %v760_v47  ;;  %v731_v52 = vld [vmem:[%s4464_s1 + $0x88] sm:$0xff]  ;;  %v762_v53 = vld [vmem:[%s4464_s1 + $0x180] sm:$0xff]  ;;  %v732_v57 = vld [vmem:[%s4464_s1 + $0x90] sm:$0xff]  ;;  %s227_s11 = scalar_lea.vmem %s4466_s3, %s2264_s8 }
  0x15   : > { %2434 = vmatpush1.bf16.msra.mxu0 %v2433_v18  ;;  %2387 = vmatprep.subr.bf16.mxu1 %v2833_v3  ;;  %s2261_s22 = sshll.u32 %s208_s10, 3  ;;  %v763_v54 = vld [vmem:[%s4464_s1 + $0x188] sm:$0xff]  ;;  %v2403_v55 = vpack.c.bf16 %v731_v52, %v730_v51  ;;  %v733_v58 = vld [vmem:[%s4464_s1 + $0x98] sm:$0xff]  ;;  %v764_v59 = vld [vmem:[%s4464_s1 + $0x190] sm:$0xff] }
  0x16   : > { %2435 = vmatprep.subr.bf16.mxu0 %v2833_v3  ;;  %s2988_s6 = scalar_lea.vmem %s4463_s0, %s2261_s22  ;;  %v2451_v56 = vpack.c.bf16 %v763_v54, %v762_v53  ;;  %v765_v60 = vld [vmem:[%s4464_s1 + $0x198] sm:$0xff]  ;;  %v2406_v61 = vpack.c.bf16 %v733_v58, %v732_v57  ;;  %v734_v63 = vld [vmem:[%s4464_s1 + $0xa0] sm:$0xff]  ;;  %v735_v0 = vld [vmem:[%s4464_s1 + $0xa8] sm:$0xff] }
  0x17   : > { %v264_v41 = vld [vmem:[%s2988_s6 + $0x1] sm:$0xff]  ;;  %v3006_v42 = vld [vmem:[%s2988_s6 + $0x12] sm:$0xff]  ;;  %v2454_v62 = vpack.c.bf16 %v765_v60, %v764_v59  ;;  %v2409_v4 = vpack.c.bf16 %v735_v0, %v734_v63  ;;  %v301_v52 = vld [vmem:[%s2988_s6 + $0xa] sm:$0xff] }
  0x18   : > { %2389 = vmatpush1.bf16.msra.mxu1 %v2388_v23  ;;  %922 = vmatprep.mubr.f32.mxu1 %v264_v41  ;;  %v766_v1 = vld [vmem:[%s4464_s1 + $0x1a0] sm:$0xff]  ;;  %v767_v2 = vld [vmem:[%s4464_s1 + $0x1a8] sm:$0xff]  ;;  %v736_v6 = vld [vmem:[%s4464_s1 + $0xb0] sm:$0xff] }
  0x19   : > { %2437 = vmatpush1.bf16.msra.mxu0 %v2436_v24  ;;  %2390 = vmatprep.subr.bf16.mxu1 %v2833_v3  ;;  %v2457_v5 = vpack.c.bf16 %v767_v2, %v766_v1  ;;  %v737_v7 = vld [vmem:[%s4464_s1 + $0xb8] sm:$0xff]  ;;  %v768_v8 = vld [vmem:[%s4464_s1 + $0x1b0] sm:$0xff]  ;;  %v738_v12 = vld [vmem:[%s4464_s1 + $0xc0] sm:$0xff] }
  0x1a   : > { %2438 = vmatprep.subr.bf16.mxu0 %v2833_v3  ;;  %1077 = vmatprep.mubr.f32.mxu0 %v3006_v42  ;;  %v769_v9 = vld [vmem:[%s4464_s1 + $0x1b8] sm:$0xff]  ;;  %v2412_v10 = vpack.c.bf16 %v737_v7, %v736_v6  ;;  %v739_v13 = vld [vmem:[%s4464_s1 + $0xc8] sm:$0xff]  ;;  %v770_v14 = vld [vmem:[%s4464_s1 + $0x1c0] sm:$0xff] }
  0x1b   : > { %v2460_v11 = vpack.c.bf16 %v769_v9, %v768_v8  ;;  %v771_v15 = vld [vmem:[%s4464_s1 + $0x1c8] sm:$0xff]  ;;  %v2415_v16 = vpack.c.bf16 %v739_v13, %v738_v12  ;;  %v740_v18 = vld [vmem:[%s4464_s1 + $0xd0] sm:$0xff]  ;;  %v741_v19 = vld [vmem:[%s4464_s1 + $0xd8] sm:$0xff] }
  0x1c   : > { %2392 = vmatpush1.bf16.msra.mxu1 %v2391_v29  ;;  %v2463_v17 = vpack.c.bf16 %v771_v15, %v770_v14  ;;  %v772_v20 = vld [vmem:[%s4464_s1 + $0x1d0] sm:$0xff]  ;;  %v773_v21 = vld [vmem:[%s4464_s1 + $0x1d8] sm:$0xff]  ;;  %v2418_v22 = vpack.c.bf16 %v741_v19, %v740_v18  ;;  %v742_v24 = vld [vmem:[%s4464_s1 + $0xe0] sm:$0xff] }
  0x1d   : > { %2440 = vmatpush1.bf16.msra.mxu0 %v2439_v30  ;;  %2393 = vmatprep.subr.bf16.mxu1 %v2833_v3  ;;  %v2466_v23 = vpack.c.bf16 %v773_v21, %v772_v20  ;;  %v743_v25 = vld [vmem:[%s4464_s1 + $0xe8] sm:$0xff]  ;;  %v774_v26 = vld [vmem:[%s4464_s1 + $0x1e0] sm:$0xff]  ;;  %v744_v30 = vld [vmem:[%s4464_s1 + $0xf0] sm:$0xff] }
  0x1e   : > { %2441 = vmatprep.subr.bf16.mxu0 %v2833_v3  ;;  %v775_v27 = vld [vmem:[%s4464_s1 + $0x1e8] sm:$0xff]  ;;  %v2421_v28 = vpack.c.bf16 %v743_v25, %v742_v24  ;;  %v745_v31 = vld [vmem:[%s4464_s1 + $0xf8] sm:$0xff]  ;;  %v776_v32 = vld [vmem:[%s4464_s1 + $0x1f0] sm:$0xff] }
  0x1f   : > { %v2469_v29 = vpack.c.bf16 %v775_v27, %v774_v26  ;;  %v777_v33 = vld [vmem:[%s4464_s1 + $0x1f8] sm:$0xff]  ;;  %v2424_v34 = vpack.c.bf16 %v745_v31, %v744_v30  ;;  %v779_v37 = vld [vmem:[%s4464_s1 + $0x208] sm:$0xff]  ;;  %v810_v38 = vld [vmem:[%s4464_s1 + $0x300] sm:$0xff] }
  0x20   : > { %2395 = vmatpush1.bf16.msra.mxu1 %v2394_v35  ;;  %v2472_v35 = vpack.c.bf16 %v777_v33, %v776_v32  ;;  %v811_v39 = vld [vmem:[%s4464_s1 + $0x308] sm:$0xff]  ;;  %v228_v40 = vld [vmem:[%s2988_s6] sm:$0xff]  ;;  %v780_v46 = vld [vmem:[%s4464_s1 + $0x210] sm:$0xff] }
  0x21   : > { %2443 = vmatpush1.bf16.msra.mxu0 %v2442_v36  ;;  %2396 = vmatprep.subr.bf16.mxu1 %v2833_v3  ;;  %v778_v36 = vld [vmem:[%s4464_s1 + $0x200] sm:$0xff]  ;;  %v781_v47 = vld [vmem:[%s4464_s1 + $0x218] sm:$0xff]  ;;  %v3161_v48 = vpack.c.bf16 %v811_v39, %v810_v38  ;;  %v229_v51 = vld [vmem:[%s2988_s6 + $0x8] sm:$0xff] }
  0x22   : > { %2444 = vmatprep.subr.bf16.mxu0 %v2833_v3  ;;  %v300_v41 = vld [vmem:[%s2988_s6 + $0x2] sm:$0xff]  ;;  %v337_v45 = vld [vmem:[%s2988_s6 + $0x1a] sm:$0xff]  ;;  %v2478_v53 = vpack.c.bf16 %v781_v47, %v780_v46  ;;  %v266_v54 = vld [vmem:[%s2988_s6 + $0x11] sm:$0xff] }
  0x23   : > { %v783_v57 = vld [vmem:[%s4464_s1 + $0x228] sm:$0xff]  ;;  %v814_v59 = vld [vmem:[%s4464_s1 + $0x320] sm:$0xff]  ;;  %v784_v1 = vld [vmem:[%s4464_s1 + $0x230] sm:$0xff] }
  0x24   : > { %2398 = vmatpush1.bf16.msra.mxu1 %v2397_v43  ;;  %v2475_v43 = vpack.c.bf16 %v779_v37, %v778_v36  ;;  %v815_v60 = vld [vmem:[%s4464_s1 + $0x328] sm:$0xff]  ;;  %v267_v63 = vld [vmem:[%s2988_s6 + $0x19] sm:$0xff]  ;;  %v788_v19 = vld [vmem:[%s4464_s1 + $0x250] sm:$0xff] }
  0x25   : > { %2446 = vmatpush1.bf16.msra.mxu0 %v2445_v44  ;;  %2399 = vmatprep.subr.bf16.mxu1 %v2833_v3  ;;  %v265_v44 = vld [vmem:[%s2988_s6 + $0x9] sm:$0xff]  ;;  %v785_v2 = vld [vmem:[%s4464_s1 + $0x238] sm:$0xff]  ;;  %v268_v8 = vld [vmem:[%s2988_s6 + $0x21] sm:$0xff] }
  0x26   : > { %2447 = vmatprep.subr.bf16.mxu0 %v2833_v3  ;;  %v339_v0 = vld [vmem:[%s2988_s6 + $0x2a] sm:$0xff]  ;;  %v817_v6 = vld [vmem:[%s4464_s1 + $0x338] sm:$0xff]  ;;  %v2484_v9 = vpack.c.bf16 %v785_v2, %v784_v1  ;;  %v818_v13 = vld [vmem:[%s4464_s1 + $0x340] sm:$0xff] }
  0x27   : > { %v231_v7 = vld [vmem:[%s2988_s6 + $0x18] sm:$0xff]  ;;  %v819_v14 = vld [vmem:[%s4464_s1 + $0x348] sm:$0xff]  ;;  %v232_v15 = vld [vmem:[%s2988_s6 + $0x20] sm:$0xff] }
  0x28   : > { %2401 = vmatpush1.bf16.msra.mxu1 %v2400_v49  ;;  %v812_v49 = vld [vmem:[%s4464_s1 + $0x310] sm:$0xff]  ;;  %v341_v18 = vld [vmem:[%s2988_s6 + $0x3a] sm:$0xff]  ;;  %v3242_v21 = vpack.c.bf16 %v819_v14, %v818_v13  ;;  %v233_v24 = vld [vmem:[%s2988_s6 + $0x28] sm:$0xff] }
  0x29   : > { %2449 = vmatpush1.bf16.msra.mxu0 %v2448_v50  ;;  %2402 = vmatprep.subr.bf16.mxu1 %v2833_v3  ;;  %v813_v50 = vld [vmem:[%s4464_s1 + $0x318] sm:$0xff]  ;;  %v342_v27 = vld [vmem:[%s2988_s6 + $0x42] sm:$0xff]  ;;  %v234_v33 = vld [vmem:[%s2988_s6 + $0x30] sm:$0xff] }
  0x2a   : > { %2450 = vmatprep.subr.bf16.mxu0 %v2833_v3  ;;  %v3181_v58 = vpack.c.bf16 %v813_v50, %v812_v49  ;;  %v789_v20 = vld [vmem:[%s4464_s1 + $0x258] sm:$0xff]  ;;  %v822_v31 = vld [vmem:[%s4464_s1 + $0x360] sm:$0xff]  ;;  %v823_v32 = vld [vmem:[%s4464_s1 + $0x368] sm:$0xff] }
  0x2b   : > { %v270_v25 = vld [vmem:[%s2988_s6 + $0x31] sm:$0xff]  ;;  %v2490_v26 = vpack.c.bf16 %v789_v20, %v788_v19  ;;  %v3282_v39 = vpack.c.bf16 %v823_v32, %v822_v31  ;;  %v794_v47 = vld [vmem:[%s4464_s1 + $0x280] sm:$0xff]  ;;  %v795_v49 = vld [vmem:[%s4464_s1 + $0x288] sm:$0xff] }
  0x2c   : > { %2404 = vmatpush1.bf16.msra.mxu1 %v2403_v55  ;;  %v338_v55 = vld [vmem:[%s2988_s6 + $0x22] sm:$0xff]  ;;  %v343_v36 = vld [vmem:[%s2988_s6 + $0x4a] sm:$0xff]  ;;  %v793_v38 = vld [vmem:[%s4464_s1 + $0x278] sm:$0xff] }
  0x2d   : > { %2452 = vmatpush1.bf16.msra.mxu0 %v2451_v56  ;;  %2405 = vmatprep.subr.bf16.mxu1 %v2833_v3  ;;  %v782_v56 = vld [vmem:[%s4464_s1 + $0x220] sm:$0xff]  ;;  %v792_v37 = vld [vmem:[%s4464_s1 + $0x270] sm:$0xff]  ;;  %v239_v19 = vld [vmem:[%s2988_s6 + $0x58] sm:$0xff] }
  0x2e   : > { %2453 = vmatprep.subr.bf16.mxu0 %v2833_v3  ;;  %v344_v46 = vld [vmem:[%s2988_s6 + $0x52] sm:$0xff]  ;;  %v346_v2 = vld [vmem:[%s2988_s6 + $0x62] sm:$0xff]  ;;  %v347_v13 = vld [vmem:[%s2988_s6 + $0x6a] sm:$0xff] }
  0x2f   : > { %v276_v20 = vld [vmem:[%s2988_s6 + $0x61] sm:$0xff]  ;;  %v277_v31 = vld [vmem:[%s2988_s6 + $0x69] sm:$0xff] }
  0x30   : > { %2407 = vmatpush1.bf16.msra.mxu1 %v2406_v61  ;;  %v230_v61 = vld [vmem:[%s2988_s6 + $0x10] sm:$0xff] }
  0x31   : > { %2455 = vmatpush1.bf16.msra.mxu0 %v2454_v62  ;;  %2408 = vmatprep.subr.bf16.mxu1 %v2833_v3  ;;  %v2481_v62 = vpack.c.bf16 %v783_v57, %v782_v56  ;;  %v345_v56 = vld [vmem:[%s2988_s6 + $0x5a] sm:$0xff] }
  0x32   : > { %2456 = vmatprep.subr.bf16.mxu0 %v2833_v3 }
  0x34   : > { %2410 = vmatpush1.bf16.msra.mxu1 %v2409_v4  ;;  %v3201_v4 = vpack.c.bf16 %v815_v60, %v814_v59  ;;  %v796_v59 = vld [vmem:[%s4464_s1 + $0x290] sm:$0xff]  ;;  %v797_v60 = vld [vmem:[%s4464_s1 + $0x298] sm:$0xff] }
  0x35   : > { %2458 = vmatpush1.bf16.msra.mxu0 %v2457_v5  ;;  %2411 = vmatprep.subr.bf16.mxu1 %v2833_v3  ;;  %v816_v5 = vld [vmem:[%s4464_s1 + $0x330] sm:$0xff]  ;;  %v2502_v1 = vpack.c.bf16 %v797_v60, %v796_v59  ;;  %v809_v60 = vld [vmem:[%s4464_s1 + $0x2f8] sm:$0xff] }
  0x36   : > { %2459 = vmatprep.subr.bf16.mxu0 %v2833_v3  ;;  %v3222_v12 = vpack.c.bf16 %v817_v6, %v816_v5  ;;  %v798_v6 = vld [vmem:[%s4464_s1 + $0x2a0] sm:$0xff]  ;;  %v808_v59 = vld [vmem:[%s4464_s1 + $0x2f0] sm:$0xff] }
  0x38   : > { %2413 = vmatpush1.bf16.msra.mxu1 %v2412_v10  ;;  %v340_v10 = vld [vmem:[%s2988_s6 + $0x32] sm:$0xff] }
  0x39   : > { %2461 = vmatpush1.bf16.msra.mxu0 %v2460_v11  ;;  %2414 = vmatprep.subr.bf16.mxu1 %v2833_v3  ;;  %v786_v11 = vld [vmem:[%s4464_s1 + $0x240] sm:$0xff] }
  0x3a   : > { %2462 = vmatprep.subr.bf16.mxu0 %v2833_v3 }
  0x3c   : > { %2416 = vmatpush1.bf16.msra.mxu1 %v2415_v16  ;;  %v269_v16 = vld [vmem:[%s2988_s6 + $0x29] sm:$0xff] }
  0x3d   : > { %2464 = vmatpush1.bf16.msra.mxu0 %v2463_v17  ;;  %2417 = vmatprep.subr.bf16.mxu1 %v2833_v3 }
  0x3e   : > { %2465 = vmatprep.subr.bf16.mxu0 %v2833_v3 }
  0x40   : > { %2419 = vmatpush1.bf16.msra.mxu1 %v2418_v22  ;;  %v820_v22 = vld [vmem:[%s4464_s1 + $0x350] sm:$0xff] }
  0x41   : > { %2467 = vmatpush1.bf16.msra.mxu0 %v2466_v23  ;;  %2420 = vmatprep.subr.bf16.mxu1 %v2833_v3  ;;  %v821_v23 = vld [vmem:[%s4464_s1 + $0x358] sm:$0xff] }
  0x42   : > { %2468 = vmatprep.subr.bf16.mxu0 %v2833_v3  ;;  %v3262_v30 = vpack.c.bf16 %v821_v23, %v820_v22  ;;  %v348_v23 = vld [vmem:[%s2988_s6 + $0x72] sm:$0xff] }
  0x44   : > { %2422 = vmatpush1.bf16.msra.mxu1 %v2421_v28  ;;  %v790_v28 = vld [vmem:[%s4464_s1 + $0x260] sm:$0xff] }
  0x45   : > { %2470 = vmatpush1.bf16.msra.mxu0 %v2469_v29  ;;  %2423 = vmatprep.subr.bf16.mxu1 %v2833_v3  ;;  %v791_v29 = vld [vmem:[%s4464_s1 + $0x268] sm:$0xff] }
  0x46   : > { %2471 = vmatprep.subr.bf16.mxu0 %v2833_v3 }
  0x48   : > { %2425 = vmatpush1.bf16.msra.mxu1 %v2424_v34  ;;  %v271_v34 = vld [vmem:[%s2988_s6 + $0x39] sm:$0xff] }
  0x49   : > { %2473 = vmatpush1.bf16.msra.mxu0 %v2472_v35  ;;  %2602 = vmatprep.subr.bf16.mxu1 %v2833_v3  ;;  %v2493_v35 = vpack.c.bf16 %v791_v29, %v790_v28  ;;  %v835_v28 = vld [vmem:[%s4464_s1 + $0x3c8] sm:$0xff]  ;;  %v240_v29 = vld [vmem:[%s2988_s6 + $0x60] sm:$0xff] }
  0x4a   : > { %2474 = vmatprep.subr.bf16.mxu0 %v2833_v3 }
  0x4b   : > { %923 = vmatmul.mubr.f32.vlgmr.msra.gmra.mrb[0].mxu1 %v228_v40  ;;  %v824_v40 = vld [vmem:[%s4464_s1 + $0x370] sm:$0xff] }
  0x4c   : > { %1078 = vmatmul.mubr.f32.vlgmr.msra.gmra.mrb[0].mxu0 %v300_v41  ;;  %927 = vmatprep.mubr.f32.mxu1 %v265_v44  ;;  %v825_v41 = vld [vmem:[%s4464_s1 + $0x378] sm:$0xff]  ;;  %v272_v44 = vld [vmem:[%s2988_s6 + $0x41] sm:$0xff] }
  0x4d   : > { %2476 = vmatpush1.bf16.msra.mxu0 %v2475_v43  ;;  %1082 = vmatprep.mubr.f32.mxu0 %v337_v45  ;;  %v235_v43 = vld [vmem:[%s2988_s6 + $0x38] sm:$0xff]  ;;  %v3302_v50 = vpack.c.bf16 %v825_v41, %v824_v40  ;;  %v241_v40 = vld [vmem:[%s2988_s6 + $0x68] sm:$0xff] }
  0x4e   : > { %2477 = vmatprep.subr.bf16.mxu0 %v2833_v3  ;;  %2618 = vmatpush1.bf16.msra.mxu1 %v3161_v48  ;;  %v278_v41 = vld [vmem:[%s2988_s6 + $0x71] sm:$0xff] }
  0x4f   : > { %928 = vmatmul.mubr.f32.gmra.mrb[2].mxu1 %v229_v51  ;;  %2603 = vmatprep.subr.bf16.mxu1 %v2833_v3  ;;  %v826_v51 = vld [vmem:[%s4464_s1 + $0x380] sm:$0xff] }
  0x50   : > { %1083 = vmatmul.mubr.f32.gmra.mrb[2].mxu0 %v301_v52  ;;  %932 = vmatprep.mubr.f32.mxu1 %v266_v54  ;;  %v827_v52 = vld [vmem:[%s4464_s1 + $0x388] sm:$0xff] }
  0x51   : > { %2479 = vmatpush1.bf16.msra.mxu0 %v2478_v53  ;;  %1087 = vmatprep.mubr.f32.mxu0 %v338_v55  ;;  %v236_v53 = vld [vmem:[%s2988_s6 + $0x40] sm:$0xff]  ;;  %v273_v54 = vld [vmem:[%s2988_s6 + $0x49] sm:$0xff]  ;;  %v3316_v57 = vpack.c.bf16 %v827_v52, %v826_v51 }
  0x52   : > { %2480 = vmatprep.subr.bf16.mxu0 %v2833_v3  ;;  %2619 = vmatpush1.bf16.msra.mxu1 %v3181_v58  ;;  %v839_v51 = vld [vmem:[%s4464_s1 + $0x3e8] sm:$0xff]  ;;  %v242_v52 = vld [vmem:[%s2988_s6 + $0x70] sm:$0xff] }
  0x53   : > { %933 = vmatmul.mubr.f32.gmra.mrb[4].mxu1 %v230_v61  ;;  %2604 = vmatprep.subr.bf16.mxu1 %v2833_v3  ;;  %v828_v61 = vld [vmem:[%s4464_s1 + $0x390] sm:$0xff] }
  0x54   : > { %1088 = vmatmul.mubr.f32.gmra.mrb[4].mxu0 %v3006_v42  ;;  %937 = vmatprep.mubr.f32.mxu1 %v267_v63  ;;  %v787_v42 = vld [vmem:[%s4464_s1 + $0x248] sm:$0xff] }
  0x55   : > { %2482 = vmatpush1.bf16.msra.mxu0 %v2481_v62  ;;  %1092 = vmatprep.mubr.f32.mxu0 %v339_v0  ;;  %v2487_v17 = vpack.c.bf16 %v787_v42, %v786_v11  ;;  %v829_v62 = vld [vmem:[%s4464_s1 + $0x398] sm:$0xff]  ;;  %v237_v63 = vld [vmem:[%s2988_s6 + $0x48] sm:$0xff] }
  0x56   : > { %2483 = vmatprep.subr.bf16.mxu0 %v2833_v3  ;;  %2620 = vmatpush1.bf16.msra.mxu1 %v3201_v4  ;;  %v3336_v5 = vpack.c.bf16 %v829_v62, %v828_v61  ;;  %v275_v11 = vld [vmem:[%s2988_s6 + $0x59] sm:$0xff]  ;;  %v840_v61 = vld [vmem:[%s4464_s1 + $0x3f0] sm:$0xff] }
  0x57   : > { %938 = vmatmul.mubr.f32.gmra.mrb[6].mxu1 %v231_v7  ;;  %2605 = vmatprep.subr.bf16.mxu1 %v2833_v3  ;;  %v799_v7 = vld [vmem:[%s4464_s1 + $0x2a8] sm:$0xff]  ;;  %v841_v62 = vld [vmem:[%s4464_s1 + $0x3f8] sm:$0xff] }
  0x58   : > { %1093 = vmatmul.mubr.f32.gmra.mrb[6].mxu0 %v337_v45  ;;  %942 = vmatprep.mubr.f32.mxu1 %v268_v8  ;;  %v2496_v45 = vpack.c.bf16 %v793_v38, %v792_v37  ;;  %v830_v8 = vld [vmem:[%s4464_s1 + $0x3a0] sm:$0xff]  ;;  %v2505_v42 = vpack.c.bf16 %v799_v7, %v798_v6  ;;  %v836_v37 = vld [vmem:[%s4464_s1 + $0x3d0] sm:$0xff]  ;;  %v837_v38 = vld [vmem:[%s4464_s1 + $0x3d8] sm:$0xff]  ;;  %v2520_v6 = vpack.c.bf16 %v809_v60, %v808_v59 }
  0x59   : > { %1097 = vmatprep.mubr.f32.mxu0 %v340_v10  ;;  %2485 = vmatpush1.bf16.msra.mxu0 %v2484_v9  ;;  %v831_v9 = vld [vmem:[%s4464_s1 + $0x3a8] sm:$0xff]  ;;  %v352_v7 = vld [vmem:[%s2988_s6 + $0x92] sm:$0xff]  ;;  %v3554_v59 = vld [vmem:[%s2988_s6 + $0x3c] sm:$0xff] }
  0x5a   : > { %2486 = vmatprep.subr.bf16.mxu0 %v2833_v3  ;;  %2621 = vmatpush1.bf16.msra.mxu1 %v3222_v12  ;;  %v3356_v14 = vpack.c.bf16 %v831_v9, %v830_v8  ;;  %v3462_v8 = vpack.c.bf16 %v841_v62, %v840_v61  ;;  %v3558_v61 = vld [vmem:[%s2988_s6 + $0x74] sm:$0xff]  ;;  %v855_v62 = vld [vmem:[%s4464_s1 + $0x468] sm:$0xff] }
  0x5b   : > { %943 = vmatmul.mubr.f32.gmra.mrb[8].mxu1 %v232_v15  ;;  %2606 = vmatprep.subr.bf16.mxu1 %v2833_v3  ;;  %v800_v15 = vld [vmem:[%s4464_s1 + $0x2b0] sm:$0xff] }
  0x5c   : > { %1098 = vmatmul.mubr.f32.gmra.mrb[8].mxu0 %v338_v55  ;;  %947 = vmatprep.mubr.f32.mxu1 %v269_v16  ;;  %v2499_v55 = vpack.c.bf16 %v795_v49, %v794_v47  ;;  %v801_v16 = vld [vmem:[%s4464_s1 + $0x2b8] sm:$0xff]  ;;  %v807_v47 = vld [vmem:[%s4464_s1 + $0x2e8] sm:$0xff]  ;;  %v838_v49 = vld [vmem:[%s4464_s1 + $0x3e0] sm:$0xff] }
  0x5d   : > { %1102 = vmatprep.mubr.f32.mxu0 %v341_v18  ;;  %2488 = vmatpush1.bf16.msra.mxu0 %v2487_v17  ;;  %v832_v17 = vld [vmem:[%s4464_s1 + $0x3b0] sm:$0xff]  ;;  %v2508_v22 = vpack.c.bf16 %v801_v16, %v800_v15 }
  0x5e   : > { %2489 = vmatprep.subr.bf16.mxu0 %v2833_v3  ;;  %2622 = vmatpush1.bf16.msra.mxu1 %v3242_v21  ;;  %v485_v15 = vld [vmem:[%s2988_s6 + $0x4d] sm:$0xff] }
  0x5f   : > { %948 = vmatmul.mubr.f32.gmra.mrb[10].mxu1 %v233_v24  ;;  %2607 = vmatprep.subr.bf16.mxu1 %v2833_v3  ;;  %v408_v16 = vld [vmem:[%s2988_s6 + $0x14] sm:$0xff] }
  0x60   : > { %1103 = vmatmul.mubr.f32.gmra.mrb[10].mxu0 %v339_v0  ;;  %952 = vmatprep.mubr.f32.mxu1 %v270_v25  ;;  %v274_v0 = vld [vmem:[%s2988_s6 + $0x51] sm:$0xff]  ;;  %v802_v25 = vld [vmem:[%s4464_s1 + $0x2c0] sm:$0xff] }
  0x61   : > { %1107 = vmatprep.mubr.f32.mxu0 %v342_v27  ;;  %2491 = vmatpush1.bf16.msra.mxu0 %v2490_v26  ;;  %v803_v26 = vld [vmem:[%s4464_s1 + $0x2c8] sm:$0xff] }
  0x62   : > { %2492 = vmatprep.subr.bf16.mxu0 %v2833_v3  ;;  %2623 = vmatpush1.bf16.msra.mxu1 %v3262_v30  ;;  %v2511_v32 = vpack.c.bf16 %v803_v26, %v802_v25  ;;  %v3487_v26 = vld [vmem:[%s2988_s6 + $0x54] sm:$0xff] }
  0x63   : > { %953 = vmatmul.mubr.f32.gmra.mrb[12].mxu1 %v234_v33  ;;  %2608 = vmatprep.subr.bf16.mxu1 %v2833_v3  ;;  %v349_v33 = vld [vmem:[%s2988_s6 + $0x7a] sm:$0xff] }
  0x64   : > { %1108 = vmatmul.mubr.f32.gmra.mrb[12].mxu0 %v340_v10  ;;  %957 = vmatprep.mubr.f32.mxu1 %v271_v34  ;;  %v238_v10 = vld [vmem:[%s2988_s6 + $0x50] sm:$0xff] }
  0x65   : > { %1112 = vmatprep.mubr.f32.mxu0 %v343_v36  ;;  %2494 = vmatpush1.bf16.msra.mxu0 %v2493_v35  ;;  %v804_v35 = vld [vmem:[%s4464_s1 + $0x2d0] sm:$0xff] }
  0x66   : > { %2495 = vmatprep.subr.bf16.mxu0 %v2833_v3  ;;  %2624 = vmatpush1.bf16.msra.mxu1 %v3282_v39 }
  0x67   : > { %958 = vmatmul.mubr.f32.gmra.mrb[14].mxu1 %v235_v43  ;;  %2609 = vmatprep.subr.bf16.mxu1 %v2833_v3 }
  0x68   : > { %1113 = vmatmul.mubr.f32.gmra.mrb[14].mxu0 %v341_v18  ;;  %962 = vmatprep.mubr.f32.mxu1 %v272_v44  ;;  %v833_v18 = vld [vmem:[%s4464_s1 + $0x3b8] sm:$0xff]  ;;  %v350_v44 = vld [vmem:[%s2988_s6 + $0x82] sm:$0xff] }
  0x69   : > { %1117 = vmatprep.mubr.f32.mxu0 %v344_v46  ;;  %2497 = vmatpush1.bf16.msra.mxu0 %v2496_v45  ;;  %v3376_v24 = vpack.c.bf16 %v833_v18, %v832_v17  ;;  %v3416_v45 = vpack.c.bf16 %v837_v38, %v836_v37  ;;  %v3474_v17 = vld [vmem:[%s2988_s6 + $0x4c] sm:$0xff]  ;;  %v374_v37 = vld [vmem:[%s2988_s6 + $0x23] sm:$0xff] }
  0x6a   : > { %2498 = vmatprep.subr.bf16.mxu0 %v2833_v3  ;;  %2625 = vmatpush1.bf16.msra.mxu1 %v3302_v50  ;;  %v844_v18 = vld [vmem:[%s4464_s1 + $0x410] sm:$0xff]  ;;  %v488_v38 = vld [vmem:[%s2988_s6 + $0x65] sm:$0xff] }
  0x6b   : > { %963 = vmatmul.mubr.f32.gmra.mrb[16].mxu1 %v236_v53  ;;  %2610 = vmatprep.subr.bf16.mxu1 %v2833_v3  ;;  %v279_v53 = vld [vmem:[%s2988_s6 + $0x79] sm:$0xff] }
  0x6c   : > { %1118 = vmatmul.mubr.f32.gmra.mrb[16].mxu0 %v342_v27  ;;  %967 = vmatprep.mubr.f32.mxu1 %v273_v54  ;;  %v834_v27 = vld [vmem:[%s4464_s1 + $0x3c0] sm:$0xff] }
  0x6d   : > { %1122 = vmatprep.mubr.f32.mxu0 %v345_v56  ;;  %2500 = vmatpush1.bf16.msra.mxu0 %v2499_v55  ;;  %v3396_v34 = vpack.c.bf16 %v835_v28, %v834_v27  ;;  %v351_v55 = vld [vmem:[%s2988_s6 + $0x8a] sm:$0xff]  ;;  %v846_v27 = vld [vmem:[%s4464_s1 + $0x420] sm:$0xff] }
  0x6e   : > { %2501 = vmatprep.subr.bf16.mxu0 %v2833_v3  ;;  %2626 = vmatpush1.bf16.msra.mxu1 %v3316_v57  ;;  %v847_v28 = vld [vmem:[%s4464_s1 + $0x428] sm:$0xff] }
  0x6f   : > { %968 = vmatmul.mubr.f32.gmra.mrb[18].mxu1 %v237_v63  ;;  %2611 = vmatprep.subr.bf16.mxu1 %v2833_v3  ;;  %v243_v63 = vld [vmem:[%s2988_s6 + $0x78] sm:$0xff] }
  0x70   : > { %1123 = vmatmul.mubr.f32.gmra.mrb[18].mxu0 %v343_v36  ;;  %972 = vmatprep.mubr.f32.mxu1 %v274_v0  ;;  %v805_v36 = vld [vmem:[%s4464_s1 + $0x2d8] sm:$0xff]  ;;  %v842_v0 = vld [vmem:[%s4464_s1 + $0x400] sm:$0xff] }
  0x71   : > { %1127 = vmatprep.mubr.f32.mxu0 %v346_v2  ;;  %2503 = vmatpush1.bf16.msra.mxu0 %v2502_v1  ;;  %v2514_v43 = vpack.c.bf16 %v805_v36, %v804_v35  ;;  %v843_v1 = vld [vmem:[%s4464_s1 + $0x408] sm:$0xff]  ;;  %v3504_v35 = vld [vmem:[%s2988_s6 + $0x5c] sm:$0xff] }
  0x72   : > { %2504 = vmatprep.subr.bf16.mxu0 %v2833_v3  ;;  %2627 = vmatpush1.bf16.msra.mxu1 %v3336_v5  ;;  %v2570_v9 = vpack.c.bf16 %v843_v1, %v842_v0  ;;  %v849_v36 = vld [vmem:[%s4464_s1 + $0x438] sm:$0xff]  ;;  %v3571_v1 = vld [vmem:[%s2988_s6 + $0x44] sm:$0xff] }
  0x73   : > { %973 = vmatmul.mubr.f32.gmra.mrb[20].mxu1 %v238_v10  ;;  %2612 = vmatprep.subr.bf16.mxu1 %v2833_v3  ;;  %v244_v10 = vld [vmem:[%s2988_s6 + $0x80] sm:$0xff] }
  0x74   : > { %1128 = vmatmul.mubr.f32.gmra.mrb[20].mxu0 %v344_v46  ;;  %977 = vmatprep.mubr.f32.mxu1 %v275_v11  ;;  %v806_v46 = vld [vmem:[%s4464_s1 + $0x2e0] sm:$0xff]  ;;  %v281_v11 = vld [vmem:[%s2988_s6 + $0x89] sm:$0xff] }
  0x75   : > { %1132 = vmatprep.mubr.f32.mxu0 %v347_v13  ;;  %2506 = vmatpush1.bf16.msra.mxu0 %v2505_v42  ;;  %v2517_v54 = vpack.c.bf16 %v807_v47, %v806_v46  ;;  %v353_v42 = vld [vmem:[%s2988_s6 + $0x9a] sm:$0xff]  ;;  %v375_v46 = vld [vmem:[%s2988_s6 + $0x2b] sm:$0xff] }
  0x76   : > { %2628 = vmatpush1.bf16.msra.mxu1 %v3356_v14  ;;  %2507 = vmatprep.subr.bf16.mxu0 %v2833_v3  ;;  %v489_v47 = vld [vmem:[%s2988_s6 + $0x6d] sm:$0xff]  ;;  %v491_v0 = vld [vmem:[%s2988_s6 + $0x7d] sm:$0xff] }
  0x77   : > { %978 = vmatmul.mubr.f32.gmra.mrb[22].mxu1 %v239_v19  ;;  %2613 = vmatprep.subr.bf16.mxu1 %v2833_v3  ;;  %v845_v19 = vld [vmem:[%s4464_s1 + $0x418] sm:$0xff] }
  0x78   : > { %1133 = vmatmul.mubr.f32.gmra.mrb[22].mxu0 %v345_v56  ;;  %982 = vmatprep.mubr.f32.mxu1 %v276_v20  ;;  %v3436_v56 = vpack.c.bf16 %v839_v51, %v838_v49  ;;  %v372_v20 = vld [vmem:[%s2988_s6 + $0x13] sm:$0xff]  ;;  %v2574_v25 = vpack.c.bf16 %v845_v19, %v844_v18  ;;  %v381_v18 = vld [vmem:[%s2988_s6 + $0x5b] sm:$0xff] }
  0x79   : > { %1137 = vmatprep.mubr.f32.mxu0 %v348_v23  ;;  %2509 = vmatpush1.bf16.msra.mxu0 %v2508_v22  ;;  %v486_v22 = vld [vmem:[%s2988_s6 + $0x55] sm:$0xff] }
  0x7a   : > { %2629 = vmatpush1.bf16.msra.mxu1 %v3376_v24  ;;  %2510 = vmatprep.subr.bf16.mxu0 %v2833_v3  ;;  %v3536_v49 = vld [vmem:[%s2988_s6 + $0x34] sm:$0xff]  ;;  %v459_v19 = vld [vmem:[%s2988_s6 + $0x9c] sm:$0xff] }
  0x7b   : > { %983 = vmatmul.mubr.f32.gmra.mrb[24].mxu1 %v240_v29  ;;  %2614 = vmatprep.subr.bf16.mxu1 %v2833_v3  ;;  %v373_v29 = vld [vmem:[%s2988_s6 + $0x1b] sm:$0xff] }
  0x7c   : > { %1138 = vmatmul.mubr.f32.gmra.mrb[24].mxu0 %v346_v2  ;;  %987 = vmatprep.mubr.f32.mxu1 %v277_v31  ;;  %v280_v2 = vld [vmem:[%s2988_s6 + $0x81] sm:$0xff] }
  0x7d   : > { %1142 = vmatprep.mubr.f32.mxu0 %v349_v33  ;;  %2512 = vmatpush1.bf16.msra.mxu0 %v2511_v32  ;;  %v487_v31 = vld [vmem:[%s2988_s6 + $0x5d] sm:$0xff] }
  0x7e   : > { %2630 = vmatpush1.bf16.msra.mxu1 %v3396_v34  ;;  %2513 = vmatprep.subr.bf16.mxu0 %v2833_v3  ;;  %v3500_v32 = vld [vmem:[%s2988_s6 + $0x24] sm:$0xff] }
  0x7f   : > { %988 = vmatmul.mubr.f32.gmra.mrb[26].mxu1 %v241_v40  ;;  %2615 = vmatprep.subr.bf16.mxu1 %v2833_v3  ;;  %v3518_v40 = vld [vmem:[%s2988_s6 + $0x2c] sm:$0xff] }
  0x80   : > { %1143 = vmatmul.mubr.f32.gmra.mrb[26].mxu0 %v347_v13  ;;  %992 = vmatprep.mubr.f32.mxu1 %v278_v41  ;;  %v245_v13 = vld [vmem:[%s2988_s6 + $0x88] sm:$0xff] }
  0x81   : > { %1147 = vmatprep.mubr.f32.mxu0 %v350_v44  ;;  %2515 = vmatpush1.bf16.msra.mxu0 %v2514_v43  ;;  %v850_v43 = vld [vmem:[%s4464_s1 + $0x440] sm:$0xff] }
  0x82   : > { %2631 = vmatpush1.bf16.msra.mxu1 %v3416_v45  ;;  %2516 = vmatprep.subr.bf16.mxu0 %v2833_v3 }
  0x83   : > { %993 = vmatmul.mubr.f32.gmra.mrb[28].mxu1 %v242_v52  ;;  %2616 = vmatprep.subr.bf16.mxu1 %v2833_v3  ;;  %v852_v52 = vld [vmem:[%s4464_s1 + $0x450] sm:$0xff] }
  0x84   : > { %1148 = vmatmul.mubr.f32.gmra.mrb[28].mxu0 %v348_v23  ;;  %997 = vmatprep.mubr.f32.mxu1 %v279_v53  ;;  %v409_v23 = vld [vmem:[%s2988_s6 + $0x1c] sm:$0xff] }
  0x85   : > { %1152 = vmatprep.mubr.f32.mxu0 %v351_v55  ;;  %2518 = vmatpush1.bf16.msra.mxu0 %v2517_v54  ;;  %v853_v53 = vld [vmem:[%s4464_s1 + $0x458] sm:$0xff] }
  0x86   : > { %2632 = vmatpush1.bf16.msra.mxu1 %v3436_v56  ;;  %2519 = vmatprep.subr.bf16.mxu0 %v2833_v3  ;;  %v376_v54 = vld [vmem:[%s2988_s6 + $0x33] sm:$0xff]  ;;  %v2590_v60 = vpack.c.bf16 %v853_v53, %v852_v52  ;;  %v483_v52 = vld [vmem:[%s2988_s6 + $0x3d] sm:$0xff]  ;;  %v484_v53 = vld [vmem:[%s2988_s6 + $0x45] sm:$0xff] }
  0x87   : > { %998 = vmatmul.mubr.f32.gmra.mrb[30].mxu1 %v243_v63  ;;  %2617 = vmatprep.subr.bf16.mxu1 %v2833_v3  ;;  %v377_v63 = vld [vmem:[%s2988_s6 + $0x3b] sm:$0xff] }
  0x88   : > { %1153 = vmatmul.mubr.f32.gmra.mrb[30].mxu0 %v349_v33  ;;  %1002 = vmatprep.mubr.f32.mxu1 %v280_v2  ;;  %v2578_v33 = vpack.c.bf16 %v847_v28, %v846_v27  ;;  %v516_v27 = vld [vmem:[%s2988_s6 + $0x26] sm:$0xff]  ;;  %v385_v28 = vld [vmem:[%s2988_s6 + $0x7b] sm:$0xff] }
  0x89   : > { %1157 = vmatprep.mubr.f32.mxu0 %v352_v7  ;;  %2521 = vmatpush1.bf16.msra.mxu0 %v2520_v6  ;;  %v3576_v6 = vld [vmem:[%s2988_s6 + $0x7c] sm:$0xff] }
  0x8a   : > { %2633 = vmatpush1.bf16.msra.mxu1 %v3462_v8  ;;  %2522 = vmatprep.subr.bf16.mxu0 %v2833_v3  ;;  %v857_v7 = vld [vmem:[%s4464_s1 + $0x478] sm:$0xff] }
  0x8b   : > { %1003 = vmatmul.mubr.f32.gmra.mrb[32].mxu1 %v244_v10  ;;  %2571 = vmatprep.subr.bf16.mxu1 %v2570_v9  ;;  %v492_v10 = vld [vmem:[%s2988_s6 + $0x85] sm:$0xff] }
  0x8c   : > { %1158 = vmatmul.mubr.f32.gmra.mrb[32].mxu0 %v350_v44  ;;  %1007 = vmatprep.mubr.f32.mxu1 %v281_v11  ;;  %v851_v44 = vld [vmem:[%s4464_s1 + $0x448] sm:$0xff] }
  0x8d   : > { %1162 = vmatprep.mubr.f32.mxu0 %v353_v42  ;;  %v2586_v51 = vpack.c.bf16 %v851_v44, %v850_v43  ;;  %v3591_v42 = vld [vmem:[%s2988_s6 + $0x84] sm:$0xff]  ;;  %v481_v43 = vld [vmem:[%s2988_s6 + $0x2d] sm:$0xff] }
  0x8e   : > { %v529_v44 = vld [vmem:[%s2988_s6 + $0x8e] sm:$0xff] }
  0x8f   : > { %1008 = vmatmul.mubr.f32.gmra.mrb[34].mxu1 %v245_v13  ;;  %v379_v13 = vld [vmem:[%s2988_s6 + $0x4b] sm:$0xff] }
  0x90   : > { %1163 = vmatmul.mubr.f32.gmra.mrb[34].mxu0 %v351_v55  ;;  %1412 = vmatprep.mubr.f32.mxu1 %v485_v15  ;;  %v490_v55 = vld [vmem:[%s2988_s6 + $0x75] sm:$0xff]  ;;  %v3600_v15 = vld [vmem:[%s2988_s6 + $0x8c] sm:$0xff] }
  0x91   : > { %1232 = vmatprep.mubr.f32.mxu0 %v408_v16  ;;  %v380_v16 = vld [vmem:[%s2988_s6 + $0x53] sm:$0xff] }
  0x93   : > { %1413 = vmatmul.mubr.f32.vlgmr.msra.gmra.mrb[36].mxu1 %v3474_v17 }
  0x94   : > { %1233 = vmatmul.mubr.f32.vlgmr.msra.gmra.mrb[0].mxu0 %v372_v20  ;;  %1417 = vmatprep.mubr.f32.mxu1 %v486_v22  ;;  %v382_v20 = vld [vmem:[%s2988_s6 + $0x63] sm:$0xff] }
  0x95   : > { %2524 = vmatpush1.bf16.msra.mxu0 %v3161_v48  ;;  %1237 = vmatprep.mubr.f32.mxu0 %v409_v23  ;;  %v848_v48 = vld [vmem:[%s4464_s1 + $0x430] sm:$0xff]  ;;  %v496_v22 = vld [vmem:[%s2988_s6 + $0xa5] sm:$0xff] }
  0x96   : > { %2525 = vmatprep.subr.bf16.mxu0 %v2833_v3  ;;  %2573 = vmatpush3.bf16.msra.mxu1 %v2570_v9  ;;  %v2582_v41 = vpack.c.bf16 %v849_v36, %v848_v48  ;;  %v378_v9 = vld [vmem:[%s2988_s6 + $0x43] sm:$0xff]  ;;  %v383_v23 = vld [vmem:[%s2988_s6 + $0x6b] sm:$0xff]  ;;  %v522_v48 = vld [vmem:[%s2988_s6 + $0x56] sm:$0xff] }
  0x97   : > { %1418 = vmatmul.mubr.f32.gmra.mrb[38].mxu1 %v3487_v26  ;;  %2575 = vmatprep.subr.bf16.mxu1 %v2574_v25  ;;  %v388_v36 = vld [vmem:[%s2988_s6 + $0x93] sm:$0xff] }
  0x98   : > { %1238 = vmatmul.mubr.f32.gmra.mrb[2].mxu0 %v373_v29  ;;  %1422 = vmatprep.mubr.f32.mxu1 %v487_v31  ;;  %v518_v29 = vld [vmem:[%s2988_s6 + $0x36] sm:$0xff]  ;;  %v386_v31 = vld [vmem:[%s2988_s6 + $0x83] sm:$0xff] }
  0x99   : > { %2527 = vmatpush1.bf16.msra.mxu0 %v3181_v58  ;;  %1242 = vmatprep.mubr.f32.mxu0 %v3500_v32  ;;  %v3522_v58 = vld [vmem:[%s2988_s6 + $0x64] sm:$0xff] }
  0x9a   : > { %2528 = vmatprep.subr.bf16.mxu0 %v2833_v3  ;;  %2577 = vmatpush3.bf16.msra.mxu1 %v2574_v25  ;;  %v497_v25 = vld [vmem:[%s2988_s6 + $0xad] sm:$0xff] }
  0x9b   : > { %1423 = vmatmul.mubr.f32.gmra.mrb[40].mxu1 %v3504_v35  ;;  %2579 = vmatprep.subr.bf16.mxu1 %v2578_v33 }
  0x9c   : > { %1243 = vmatmul.mubr.f32.gmra.mrb[4].mxu0 %v374_v37  ;;  %1427 = vmatprep.mubr.f32.mxu1 %v488_v38  ;;  %v524_v37 = vld [vmem:[%s2988_s6 + $0x66] sm:$0xff]  ;;  %v526_v38 = vld [vmem:[%s2988_s6 + $0x76] sm:$0xff] }
  0x9d   : > { %2530 = vmatpush1.bf16.msra.mxu0 %v3201_v4  ;;  %1247 = vmatprep.mubr.f32.mxu0 %v3518_v40  ;;  %v3540_v4 = vld [vmem:[%s2988_s6 + $0x6c] sm:$0xff] }
  0x9e   : > { %2531 = vmatprep.subr.bf16.mxu0 %v2833_v3  ;;  %2581 = vmatpush3.bf16.msra.mxu1 %v2578_v33  ;;  %v520_v33 = vld [vmem:[%s2988_s6 + $0x46] sm:$0xff] }
  0x9f   : > { %1428 = vmatmul.mubr.f32.gmra.mrb[42].mxu1 %v3522_v58  ;;  %2583 = vmatprep.subr.bf16.mxu1 %v2582_v41 }
  0xa0   : > { %1248 = vmatmul.mubr.f32.gmra.mrb[6].mxu0 %v375_v46  ;;  %1432 = vmatprep.mubr.f32.mxu1 %v489_v47  ;;  %v530_v46 = vld [vmem:[%s2988_s6 + $0x96] sm:$0xff] }
  0xa1   : > { %1252 = vmatprep.mubr.f32.mxu0 %v3536_v49  ;;  %2533 = vmatpush1.bf16.msra.mxu0 %v3222_v12  ;;  %v854_v12 = vld [vmem:[%s4464_s1 + $0x460] sm:$0xff]  ;;  %v482_v47 = vld [vmem:[%s2988_s6 + $0x35] sm:$0xff] }
  0xa2   : > { %2534 = vmatprep.subr.bf16.mxu0 %v2833_v3  ;;  %2585 = vmatpush3.bf16.msra.mxu1 %v2582_v41  ;;  %v2594_v2 = vpack.c.bf16 %v855_v62, %v854_v12  ;;  %v480_v41 = vld [vmem:[%s2988_s6 + $0x25] sm:$0xff] }
  0xa3   : > { %1433 = vmatmul.mubr.f32.gmra.mrb[44].mxu1 %v3540_v4  ;;  %2587 = vmatprep.subr.bf16.mxu1 %v2586_v51 }
  0xa4   : > { %1253 = vmatmul.mubr.f32.gmra.mrb[8].mxu0 %v376_v54  ;;  %1437 = vmatprep.mubr.f32.mxu1 %v490_v55 }
  0xa5   : > { %1257 = vmatprep.mubr.f32.mxu0 %v3554_v59  ;;  %2536 = vmatpush1.bf16.msra.mxu0 %v3242_v21  ;;  %v856_v21 = vld [vmem:[%s4464_s1 + $0x470] sm:$0xff] }
  0xa6   : > { %2537 = vmatprep.subr.bf16.mxu0 %v2833_v3  ;;  %2589 = vmatpush3.bf16.msra.mxu1 %v2586_v51  ;;  %v2598_v11 = vpack.c.bf16 %v857_v7, %v856_v21  ;;  %v531_v51 = vld [vmem:[%s2988_s6 + $0x9e] sm:$0xff] }
  0xa7   : > { %1438 = vmatmul.mubr.f32.gmra.mrb[46].mxu1 %v3558_v61  ;;  %2591 = vmatprep.subr.bf16.mxu1 %v2590_v60 }
  0xa8   : > { %1258 = vmatmul.mubr.f32.gmra.mrb[10].mxu0 %v377_v63  ;;  %1442 = vmatprep.mubr.f32.mxu1 %v491_v0 }
  0xa9   : > { %1262 = vmatprep.mubr.f32.mxu0 %v3571_v1  ;;  %2539 = vmatpush1.bf16.msra.mxu0 %v3262_v30  ;;  %v493_v30 = vld [vmem:[%s2988_s6 + $0x8d] sm:$0xff] }
  0xaa   : > { %2540 = vmatprep.subr.bf16.mxu0 %v2833_v3  ;;  %2593 = vmatpush3.bf16.msra.mxu1 %v2590_v60 }
  0xab   : > { %1443 = vmatmul.mubr.f32.gmra.mrb[48].mxu1 %v3576_v6  ;;  %2595 = vmatprep.subr.bf16.mxu1 %v2594_v2 }
  0xac   : > { %1263 = vmatmul.mubr.f32.gmra.mrb[12].mxu0 %v378_v9  ;;  %1447 = vmatprep.mubr.f32.mxu1 %v492_v10 }
  0xad   : > { %1267 = vmatprep.mubr.f32.mxu0 %v3474_v17  ;;  %2542 = vmatpush1.bf16.msra.mxu0 %v3282_v39  ;;  %v494_v39 = vld [vmem:[%s2988_s6 + $0x95] sm:$0xff] }
  0xae   : > { %2543 = vmatprep.subr.bf16.mxu0 %v2833_v3  ;;  %2597 = vmatpush3.bf16.msra.mxu1 %v2594_v2  ;;  %v3609_v17 = vld [vmem:[%s2988_s6 + $0x94] sm:$0xff] }
  0xaf   : > { %1448 = vmatmul.mubr.f32.gmra.mrb[50].mxu1 %v3591_v42  ;;  %2599 = vmatprep.subr.bf16.mxu1 %v2598_v11 }
  0xb0   : > { %1268 = vmatmul.mubr.f32.gmra.mrb[14].mxu0 %v379_v13  ;;  %1452 = vmatprep.mubr.f32.mxu1 %v493_v30 }
  0xb1   : > { %1272 = vmatprep.mubr.f32.mxu0 %v3487_v26  ;;  %2545 = vmatpush1.bf16.msra.mxu0 %v3302_v50  ;;  %v495_v50 = vld [vmem:[%s2988_s6 + $0x9d] sm:$0xff]  ;;  %v384_v26 = vld [vmem:[%s2988_s6 + $0x73] sm:$0xff] }
  0xb2   : > { %2546 = vmatprep.subr.bf16.mxu0 %v2833_v3  ;;  %2601 = vmatpush3.bf16.msra.mxu1 %v2598_v11 }
  0xb3   : > { %1453 = vmatmul.mubr.f32.gmra.mrb[52].mxu1 %v3600_v15 }
  0xb4   : > { %1273 = vmatmul.mubr.f32.gmra.mrb[16].mxu0 %v380_v16  ;;  %1457 = vmatprep.mubr.f32.mxu1 %v494_v39 }
  0xb5   : > { %1277 = vmatprep.mubr.f32.mxu0 %v3504_v35  ;;  %2548 = vmatpush1.bf16.msra.mxu0 %v3316_v57  ;;  %v460_v57 = vld [vmem:[%s2988_s6 + $0xa4] sm:$0xff] }
  0xb6   : > { %2549 = vmatprep.subr.bf16.mxu0 %v2833_v3  ;;  %v387_v35 = vld [vmem:[%s2988_s6 + $0x8b] sm:$0xff] }
  0xb7   : > { %1458 = vmatmul.mubr.f32.gmra.mrb[54].mxu1 %v3609_v17 }
  0xb8   : > { %1278 = vmatmul.mubr.f32.gmra.mrb[18].mxu0 %v381_v18  ;;  %1462 = vmatprep.mubr.f32.mxu1 %v495_v50 }
  0xb9   : > { %1282 = vmatprep.mubr.f32.mxu0 %v3522_v58  ;;  %2551 = vmatpush1.bf16.msra.mxu0 %v3336_v5  ;;  %v461_v5 = vld [vmem:[%s2988_s6 + $0xac] sm:$0xff]  ;;  %v527_v58 = vld [vmem:[%s2988_s6 + $0x7e] sm:$0xff] }
  0xba   : > { %2552 = vmatprep.subr.bf16.mxu0 %v2833_v3 }
  0xbb   : > { %1463 = vmatmul.mubr.f32.gmra.mrb[56].mxu1 %v459_v19 }
  0xbc   : > { %1283 = vmatmul.mubr.f32.gmra.mrb[20].mxu0 %v382_v20  ;;  %1467 = vmatprep.mubr.f32.mxu1 %v496_v22 }
  0xbd   : > { %1287 = vmatprep.mubr.f32.mxu0 %v3540_v4  ;;  %2554 = vmatpush1.bf16.msra.mxu0 %v3356_v14  ;;  %v517_v14 = vld [vmem:[%s2988_s6 + $0x2e] sm:$0xff]  ;;  %v532_v4 = vld [vmem:[%s2988_s6 + $0xa6] sm:$0xff] }
  0xbe   : > { %2555 = vmatprep.subr.bf16.mxu0 %v2833_v3 }
  0xbf   : > { %1468 = vmatmul.mubr.f32.gmra.mrb[58].mxu1 %v460_v57 }
  0xc0   : > { %1288 = vmatmul.mubr.f32.gmra.mrb[22].mxu0 %v383_v23  ;;  %1472 = vmatprep.mubr.f32.mxu1 %v497_v25 }
  0xc1   : > { %1292 = vmatprep.mubr.f32.mxu0 %v3558_v61  ;;  %2557 = vmatpush1.bf16.msra.mxu0 %v3376_v24  ;;  %v519_v24 = vld [vmem:[%s2988_s6 + $0x3e] sm:$0xff] }
  0xc2   : > { %2558 = vmatprep.subr.bf16.mxu0 %v2833_v3 }
  0xc3   : > { %1473 = vmatmul.mubr.f32.gmra.mrb[60].mxu1 %v461_v5 }
  0xc4   : > { %1293 = vmatmul.mubr.f32.gmra.mrb[24].mxu0 %v384_v26  ;;  %2351 = vmatprep.mubr.f32.mxu1 %v516_v27 }
  0xc5   : > { %1297 = vmatprep.mubr.f32.mxu0 %v3576_v6  ;;  %2560 = vmatpush1.bf16.msra.mxu0 %v3396_v34  ;;  %v521_v34 = vld [vmem:[%s2988_s6 + $0x4e] sm:$0xff] }
  0xc6   : > { %2561 = vmatprep.subr.bf16.mxu0 %v2833_v3 }
  0xc7   : > { %2352 = vmatmul.mubr.f32.vlgmr.msra.gmra.mrb[62].mxu1 %v517_v14 }
  0xc8   : > { %1298 = vmatmul.mubr.f32.gmra.mrb[26].mxu0 %v385_v28  ;;  %2354 = vmatprep.mubr.f32.mxu1 %v518_v29 }
  0xc9   : > { %1302 = vmatprep.mubr.f32.mxu0 %v3591_v42  ;;  %2563 = vmatpush1.bf16.msra.mxu0 %v3416_v45  ;;  %v523_v45 = vld [vmem:[%s2988_s6 + $0x5e] sm:$0xff] }
  0xca   : > { %2564 = vmatprep.subr.bf16.mxu0 %v2833_v3 }
  0xcb   : > { %2355 = vmatmul.mubr.f32.gmra.mrb[64].mxu1 %v519_v24  ;;  %v1651_v24 = vlaneseq }
  0xcc   : > { %1303 = vmatmul.mubr.f32.gmra.mrb[28].mxu0 %v386_v31  ;;  %2357 = vmatprep.mubr.f32.mxu1 %v520_v33 }
  0xcd   : > { %1307 = vmatprep.mubr.f32.mxu0 %v3600_v15  ;;  %2566 = vmatpush1.bf16.msra.mxu0 %v3436_v56  ;;  %v525_v56 = vld [vmem:[%s2988_s6 + $0x6e] sm:$0xff] }
  0xce   : > { %2567 = vmatprep.subr.bf16.mxu0 %v2833_v3  ;;  %v389_v3 = vld [vmem:[%s2988_s6 + $0x9b] sm:$0xff] }
  0xcf   : > { %2358 = vmatmul.mubr.f32.gmra.mrb[66].mxu1 %v521_v34  ;;  %v3710_v34 = vshrl.u32 %v1651_v24, 7 }
  0xd0   : > { %1308 = vmatmul.mubr.f32.gmra.mrb[30].mxu0 %v387_v35  ;;  %2360 = vmatprep.mubr.f32.mxu1 %v522_v48 }
  0xd1   : > { %1312 = vmatprep.mubr.f32.mxu0 %v3609_v17  ;;  %2569 = vmatpush1.bf16.msra.mxu0 %v3462_v8  ;;  %v528_v8 = vld [vmem:[%s2988_s6 + $0x86] sm:$0xff] }
  0xd3   : > { %2361 = vmatmul.mubr.f32.gmra.mrb[68].mxu1 %v523_v45  ;;  %v1657_v45 = vadd.s32 40, %v3710_v34 }
  0xd4   : > { %1313 = vmatmul.mubr.f32.gmra.mrb[32].mxu0 %v388_v36  ;;  %2363 = vmatprep.mubr.f32.mxu1 %v524_v37  ;;  %v1659_v36 = vadd.s32 56, %v3710_v34 }
  0xd5   : > { %1317 = vmatprep.mubr.f32.mxu0 %v459_v19 }
  0xd7   : > { %2364 = vmatmul.mubr.f32.gmra.mrb[70].mxu1 %v525_v56 }
  0xd8   : > { %1318 = vmatmul.mubr.f32.gmra.mrb[34].mxu0 %v389_v3  ;;  %2366 = vmatprep.mubr.f32.mxu1 %v526_v38  ;;  %v3714_v3 = vmul.u32.u64.low 3817748708, %v1657_v45  ;;  %v3715_v38 = vmul.u32.u64.high 3817748708, %v1657_v45, %v3714_v3 }
  0xd9   : > { %1387 = vmatprep.mubr.f32.mxu0 %v480_v41 }
  0xdb   : > { %2367 = vmatmul.mubr.f32.gmra.mrb[72].mxu1 %v527_v58  ;;  %v3717_v41 = vmul.u32.u64.low 3817748708, %v1659_v36  ;;  %v3718_v58 = vmul.u32.u64.high 3817748708, %v1659_v36, %v3717_v41 }
  0xdc   : > { %1388 = vmatmul.mubr.f32.vlgmr.msra.gmra.mrb[0].mxu0 %v3500_v32  ;;  %2369 = vmatprep.mubr.f32.mxu1 %v528_v8  ;;  %v533_v32 = vld [vmem:[%s2988_s6 + $0xae] sm:$0xff]  ;;  %s2713_s6 = smul.u32 18, %s4544_s12 }
  0xdd   : > { %1392 = vmatprep.mubr.f32.mxu0 %v481_v43 }
  0xde   : > { %s3895_s27 = sadd.s32 %s2714_s26, %s2713_s6 }
  0xdf   : > { %2370 = vmatmul.mubr.f32.gmra.mrb[74].mxu1 %v529_v44  ;;  %s2262_s28 = sshll.u32 %s3895_s27, 3 }
  0xe0   : > { %1393 = vmatmul.mubr.f32.gmra.mrb[2].mxu0 %v3518_v40  ;;  %2372 = vmatprep.mubr.f32.mxu1 %v530_v46  ;;  %s3976_s4 = scalar_lea.vmem %s4465_s2, %s2262_s28 }
  0xe1   : > { %1397 = vmatprep.mubr.f32.mxu0 %v482_v47 }
  0xe3   : > { %2373 = vmatmul.mubr.f32.gmra.mrb[76].mxu1 %v531_v51  ;;  %v1658_v51 = vadd.s32 48, %v3710_v34 }
  0xe4   : > { %1398 = vmatmul.mubr.f32.gmra.mrb[4].mxu0 %v3536_v49  ;;  %2375 = vmatprep.mubr.f32.mxu1 %v532_v4 }
  0xe5   : > { %1402 = vmatprep.mubr.f32.mxu0 %v483_v52 }
  0xe7   : > { %2376 = vmatmul.mubr.f32.gmra.mrb[78].mxu1 %v533_v32  ;;  %v3728_v32 = vadd.s32 72, %v3710_v34 }
  0xe8   : > { %1403 = vmatmul.mubr.f32.gmra.mrb[6].mxu0 %v3554_v59 }
  0xe9   : > { %1407 = vmatprep.mubr.f32.mxu0 %v484_v53 }
  0xec   : > { %1408 = vmatmul.mubr.f32.gmra.mrb[8].mxu0 %v3571_v1 }
 0x11e   : > { %v3678_v54 = vpop.f32.mrb[0].mxu1 }
 0x11f   : > { %v926_v40 = vpop.f32.mrb[1].mxu1 }
 0x122   : > { %v3680_v55 = vpop.f32.mrb[2].mxu1 }
 0x123   : > { %v931_v60 = vpop.f32.mrb[3].mxu1 }
 0x124   : > { %v1731_v60 = vshrl.u32 %v3715_v38, 4 }
 0x126   : > { %v3682_v61 = vpop.f32.mrb[4].mxu1 }
 0x127   : > { %v936_v12 = vpop.f32.mrb[5].mxu1 }
 0x12a   : > { %v3684_v49 = vpop.f32.mrb[6].mxu1 }
 0x12b   : > { %v941_v62 = vpop.f32.mrb[7].mxu1 }
 0x12e   : > { %v3686_v63 = vpop.f32.mrb[8].mxu1 }
 0x12f   : > { %v946_v0 = vpop.f32.mrb[9].mxu1 }
 0x132   : > { %v949_v2 = vpop.f32.mrb[10].mxu1 }
 0x133   : > { %v951_v59 = vpop.f32.mrb[11].mxu1 }
 0x134   : > { %v3731_v0 = vmul.u32.u64.low 3817748708, %v1658_v51  ;;  %v3732_v59 = vmul.u32.u64.high 3817748708, %v1658_v51, %v3731_v0 }
 0x136   : > { %v954_v6 = vpop.f32.mrb[12].mxu1 }
 0x137   : > { %v956_v21 = vpop.f32.mrb[13].mxu1 }
 0x138   : > { %v3736_v21 = vadd.s32 64, %v3710_v34 }
 0x13a   : > { %v3688_v1 = vpop.f32.mrb[14].mxu1 }
 0x13b   : > { %v961_v7 = vpop.f32.mrb[15].mxu1 }
 0x13e   : > { %v3690_v9 = vpop.f32.mrb[16].mxu1 }
 0x13f   : > { %v966_v10 = vpop.f32.mrb[17].mxu1 }
 0x142   : > { %v3692_v11 = vpop.f32.mrb[18].mxu1 }
 0x143   : > { %v971_v42 = vpop.f32.mrb[19].mxu1 }
 0x146   : > { %v3694_v13 = vpop.f32.mrb[20].mxu1 }
 0x147   : > { %v976_v30 = vpop.f32.mrb[21].mxu1 }
 0x148   : > { %v3743_v42 = vmul.u32.u64.low 3817748708, %v3728_v32  ;;  %v3744_v30 = vmul.u32.u64.high 3817748708, %v3728_v32, %v3743_v42 }
 0x14a   : > { %v3696_v15 = vpop.f32.mrb[22].mxu1 }
 0x14b   : > { %v981_v16 = vpop.f32.mrb[23].mxu1 }
 0x14e   : > { %v3698_v39 = vpop.f32.mrb[24].mxu1 }
 0x14f   : > { %v986_v17 = vpop.f32.mrb[25].mxu1 }
 0x152   : > { %v3700_v18 = vpop.f32.mrb[26].mxu1 }
 0x153   : > { %v991_v50 = vpop.f32.mrb[27].mxu1 }
 0x156   : > { %v3702_v19 = vpop.f32.mrb[28].mxu1 }
 0x157   : > { %v996_v20 = vpop.f32.mrb[29].mxu1 }
 0x15a   : > { %v3704_v22 = vpop.f32.mrb[30].mxu1 }
 0x15b   : > { %v1001_v57 = vpop.f32.mrb[31].mxu1 }
 0x15e   : > { %v3706_v23 = vpop.f32.mrb[32].mxu1 }
 0x15f   : > { %v1006_v25 = vpop.f32.mrb[33].mxu1 }
 0x162   : > { %v3708_v5 = vpop.f32.mrb[34].mxu1 }
 0x163   : > { %v1011_v26 = vpop.f32.mrb[35].mxu1 }
 0x164   : > { %v3748_v25 = vmul.u32.u64.low 3817748708, %v3736_v21  ;;  %v3749_v26 = vmul.u32.u64.high 3817748708, %v3736_v21, %v3748_v25 }
 0x166   : > { %v1414_v27 = vpop.f32.mrb[36].mxu1 }
 0x167   : > { %v1416_v14 = vpop.f32.mrb[37].mxu1 }
 0x16a   : > { %v1419_v28 = vpop.f32.mrb[38].mxu1 }
 0x16b   : > { %v1421_v29 = vpop.f32.mrb[39].mxu1 }
 0x16e   : > { %v1424_v31 = vpop.f32.mrb[40].mxu1 }
 0x16f   : > { %v1426_v33 = vpop.f32.mrb[41].mxu1 }
 0x172   : > { %v1429_v35 = vpop.f32.mrb[42].mxu1 }
 0x173   : > { %v1431_v48 = vpop.f32.mrb[43].mxu1 }
 0x176   : > { %v1434_v37 = vpop.f32.mrb[44].mxu1 }
 0x177   : > { %v1436_v56 = vpop.f32.mrb[45].mxu1 }
 0x178   : > { %v1742_v56 = vshrl.u32 %v3732_v59, 4 }
 0x17a   : > { %v3720_v8 = vpop.f32.mrb[46].mxu1 }
 0x17b   : > { %v1259_v43 = vpop.f32.mrb[10].mxu0  ;;  %v1441_v44 = vpop.f32.mrb[47].mxu1 }
 0x17c   : > { %v2639_v46 = vadd.f32 %v1259_v43, %v949_v2  ;;  %v1261_v47 = vpop.f32.mrb[11].mxu0  ;;  %v1753_v2 = vshrl.u32 %v3718_v58, 4  ;;  %v1775_v58 = vshrl.u32 %v3744_v30, 4 }
 0x17d   : > { %v1764_v47 = vshrl.u32 %v3749_v26, 4 }
 0x17e   : > { %v3723_v4 = vadd.f32 %v2639_v46, %v1414_v27  ;;  %v3725_v52 = vpop.f32.mrb[48].mxu1  ;;  %v1754_v57 = vmul.u32 18, %v1753_v2  ;;  %v1743_v46 = vmul.u32 18, %v1742_v56 }
 0x17f   : > { %v1264_v53 = vpop.f32.mrb[12].mxu0  ;;  %v1446_v40 = vpop.f32.mrb[49].mxu1 }
 0x180   : > { %v2641_v12 = vadd.f32 %v1264_v53, %v954_v6  ;;  %v1266_v62 = vpop.f32.mrb[13].mxu0  ;;  %v1732_v6 = vmul.u32 18, %v1731_v60  ;;  %v3757_v3 = vsub.s32 %v1659_v36, %v1754_v57  ;;  %v1776_v60 = vmul.u32 18, %v1775_v58 }
 0x181   : > { %v3785_v2 = vsub.s32 %v1658_v51, %v1743_v46  ;;  %v3849_v46 = vadd.s32 104, %v3710_v34  ;;  %v3862_v40 = vadd.s32 24, %v3710_v34 }
 0x182   : > { %v3738_v7 = vadd.f32 %v2641_v12, %v1419_v28  ;;  %v3740_v10 = vpop.f32.mrb[50].mxu1  ;;  %v1733_v24 = vsub.s32 %v1657_v45, %v1732_v6  ;;  %vm1875_vm2 = vcmp.ne.s32.totalorder %v3757_v3, 0  ;;  %vm1893_vm4 = vcmp.lt.s32.totalorder %v3757_v3, 0 }
 0x183   : > { %v1269_v16 = vpop.f32.mrb[14].mxu0  ;;  %v1451_v17 = vpop.f32.mrb[51].mxu1  ;;  %vm3791_vm5 = vmand %vm1893_vm4, %vm1875_vm2  ;;  %vm1874_vm7 = vcmp.ne.s32.totalorder %v3785_v2, 0  ;;  %vm1892_vm8 = vcmp.lt.s32.totalorder %v3785_v2, 0 }
 0x184   : > { %v2643_v50 = vadd.f32 %v1269_v16, %v3688_v1  ;;  %v1271_v20 = vpop.f32.mrb[15].mxu0  ;;  %v3760_v1 = vmul.u32.u64.low 3817748708, %v3710_v34  ;;  %v3761_v38 = vmul.u32.u64.high 3817748708, %v3710_v34, %v3760_v1  ;;  %vm1873_vm0 = vcmp.ne.s32.totalorder %v1733_v24, 0  ;;  %vm3856_vm11 = vmand %vm1892_vm8, %vm1874_vm7 }
 0x185   : > { %vm1891_vm1 = vcmp.lt.s32.totalorder %v1733_v24, 0  ;;  %v1927_v36 = vadd.s32 18, %v1733_v24  ;;  %v1765_v16 = vmul.u32 18, %v1764_v47 }
 0x186   : > { %v3751_v27 = vadd.f32 %v2643_v50, %v1424_v31  ;;  %v3753_v14 = vpop.f32.mrb[52].mxu1  ;;  %vm3775_vm3 = vmand %vm1891_vm1, %vm1873_vm0  ;;  %v1676_v17 = vshrl.u32 %v3761_v38, 4  ;;  %v3805_v50 = vsub.s32 %v3728_v32, %v1776_v60 }
 0x187   : > { %v1274_v28 = vpop.f32.mrb[16].mxu0  ;;  %v1456_v29 = vpop.f32.mrb[53].mxu1  ;;  %v1945_v42 = vsel %vm3775_vm3, %v1927_v36, %v1733_v24 }
 0x188   : > { %v2645_v33 = vadd.f32 %v1274_v28, %v3690_v9  ;;  %v1276_v48 = vpop.f32.mrb[17].mxu0  ;;  %v3812_v28 = vadd.s32 80, %v3710_v34  ;;  %vm3815_vm6 = vcmp.lt.s32.totalorder %v1945_v42, 16  ;;  %vm1877_vm9 = vcmp.ne.s32.totalorder %v3805_v50, 0 }
 0x189   : > { %vm1895_vm10 = vcmp.lt.s32.totalorder %v3805_v50, 0 }
 0x18a   : > { %v3763_v41 = vadd.f32 %v2645_v33, %v1429_v35  ;;  %v3765_v31 = vpop.f32.mrb[54].mxu1  ;;  %v1677_v33 = vmul.u32 18, %v1676_v17  ;;  %vm3872_vm13 = vmand %vm1895_vm10, %vm1877_vm9 }
 0x18b   : > { %v1279_v43 = vpop.f32.mrb[18].mxu0  ;;  %v1461_v44 = vpop.f32.mrb[55].mxu1 }
 0x18c   : > { %v2647_v9 = vadd.f32 %v1279_v43, %v3692_v11  ;;  %v1281_v45 = vpop.f32.mrb[19].mxu0  ;;  %v3781_v11 = vadd.s32 8, %v3710_v34  ;;  %v1928_v44 = vadd.s32 18, %v3785_v2 }
 0x18e   : > { %v3771_v53 = vadd.f32 %v2647_v9, %v1434_v37  ;;  %v3773_v35 = vpop.f32.mrb[56].mxu1  ;;  %v1929_v37 = vadd.s32 18, %v3757_v3  ;;  %v3808_v20 = vmul.u32.u64.low 3817748708, %v3781_v11  ;;  %v3809_v57 = vmul.u32.u64.high 3817748708, %v3781_v11, %v3808_v20 }
 0x18f   : > { %v1284_v12 = vpop.f32.mrb[20].mxu0  ;;  %v1466_v62 = vpop.f32.mrb[57].mxu1  ;;  %v3845_v9 = vmul.u32.u64.low 3817748708, %v3812_v28  ;;  %v3846_v45 = vmul.u32.u64.high 3817748708, %v3812_v28, %v3845_v9  ;;  %v1946_v17 = vsel %vm3856_vm11, %v1928_v44, %v3785_v2 }
 0x190   : > { %v2649_v0 = vadd.f32 %v1284_v12, %v3694_v13  ;;  %v1286_v59 = vpop.f32.mrb[21].mxu0  ;;  %v3797_v13 = vadd.s32 88, %v3710_v34  ;;  %v1947_v32 = vsel %vm3791_vm5, %v1929_v37, %v3757_v3  ;;  %v3838_v3 = vsub.s32 %v3736_v21, %v1765_v16 }
 0x191   : > { %v1931_v21 = vadd.s32 18, %v3805_v50  ;;  %vm3864_vm12 = vcmp.lt.s32.totalorder %v1947_v32, 16  ;;  %v3877_v12 = vsub.s32 %v3710_v34, %v1677_v33  ;;  %v1687_v37 = vshrl.u32 %v3809_v57, 4 }
 0x192   : > { %v3800_v6 = vadd.f32 %v2649_v0, %v3720_v8  ;;  %v3802_v51 = vpop.f32.mrb[58].mxu1  ;;  %v3826_v48 = vmul.u32.u64.low 3817748708, %v3797_v13  ;;  %v3827_v56 = vmul.u32.u64.high 3817748708, %v3797_v13, %v3826_v48  ;;  %vm1876_vm14 = vcmp.ne.s32.totalorder %v3838_v3, 0 }
 0x193   : > { %v1289_v25 = vpop.f32.mrb[22].mxu0  ;;  %v1471_v26 = vpop.f32.mrb[59].mxu1  ;;  %vm1894_vm15 = vcmp.lt.s32.totalorder %v3838_v3, 0  ;;  %v1930_v20 = vadd.s32 18, %v3838_v3  ;;  %vm1868_vm1 = vcmp.ne.s32.totalorder %v3877_v12, 0  ;;  %vm1886_vm2 = vcmp.lt.s32.totalorder %v3877_v12, 0 }
 0x194   : > { %v2651_v29 = vadd.f32 %v1289_v25, %v3696_v15  ;;  %v1291_v24 = vpop.f32.mrb[23].mxu0  ;;  %v3830_v15 = vadd.s32 16, %v3710_v34  ;;  %v3902_v25 = vmul.u32.u64.low 3817748708, %v3849_v46  ;;  %v3903_v26 = vmul.u32.u64.high 3817748708, %v3849_v46, %v3902_v25  ;;  %vm3915_vm0 = vmand %vm1894_vm15, %vm1876_vm14 }
 0x195   : > { %v3910_v24 = vmul.u32.u64.low 3817748708, %v3862_v40  ;;  %v3911_v32 = vmul.u32.u64.high 3817748708, %v3862_v40, %v3910_v24  ;;  %v3923_v33 = vadd.s32 32, %v3710_v34  ;;  %v1688_v48 = vmul.u32 18, %v1687_v37  ;;  %vm3964_vm5 = vmand %vm1886_vm2, %vm1868_vm1 }
 0x196   : > { %v3832_v1 = vpop.f32.mrb[60].mxu1  ;;  %v3841_v38 = vadd.f32 %v2651_v29, %v3725_v52  ;;  %v3880_v62 = vmul.u32.u64.low 3817748708, %v3830_v15  ;;  %v3881_v0 = vmul.u32.u64.high 3817748708, %v3830_v15, %v3880_v62  ;;  %v1949_v29 = vsel %vm3872_vm13, %v1931_v21, %v3805_v50 }
 0x197   : > { %v1294_v58 = vpop.f32.mrb[24].mxu0  ;;  %v1476_v43 = vpop.f32.mrb[61].mxu1  ;;  %v1786_v52 = vshrl.u32 %v3846_v45, 4  ;;  %vm3949_vm3 = vcmp.lt.s32.totalorder %v1946_v17, 16  ;;  %vm3953_vm4 = vcmp.lt.s32.totalorder %v1949_v29, 16  ;;  %v1948_v60 = vsel %vm3915_vm0, %v1930_v20, %v3838_v3 }
 0x198   : > { %v2653_v36 = vadd.f32 %v1294_v58, %v3698_v39  ;;  %v1296_v47 = vpop.f32.mrb[25].mxu0  ;;  %v3932_v43 = vadd.s32 96, %v3710_v34  ;;  %v1698_v37 = vshrl.u32 %v3881_v0, 4  ;;  %v3979_v20 = vsub.s32 %v3781_v11, %v1688_v48 }
 0x199   : > { %v3997_v11 = vadd.s32 120, %v3710_v34 }
 0x19a   : > { %v3883_v59 = vpop.f32.mrb[62].mxu1  ;;  %v3889_v42 = vadd.f32 %v2653_v36, %v3740_v10  ;;  %v2834_v36 = vmov 0.0   ;;  %vm1869_vm8 = vcmp.ne.s32.totalorder %v3979_v20, 0  ;;  %vm1887_vm9 = vcmp.lt.s32.totalorder %v3979_v20, 0 }
 0x19b   : > { %v1299_v30 = vpop.f32.mrb[26].mxu0  ;;  %v3891_v16 = vpop.f32.mrb[63].mxu1  ;;  %v3944_v47 = vsel %vm3864_vm12, 1.0, %v2834_v36  ;;  %vm4055_vm11 = vmand %vm1887_vm9, %vm1869_vm8 }
 0x19c   : > { %v2655_v10 = vadd.f32 %v1299_v30, %v3700_v18  ;;  %v1301_v57 = vpop.f32.mrb[27].mxu0  ;;  %v1797_v18 = vshrl.u32 %v3827_v56, 4  ;;  %v3939_v56 = vsel %vm3815_vm6, 1.0, %v2834_v36  ;;  %vm4020_vm6 = vcmp.lt.s32.totalorder %v1948_v60, 16 }
 0x19d   : > { %v3970_v30 = vmul.u32.u64.low 3817748708, %v3923_v33  ;;  %v3971_v17 = vmul.u32.u64.high 3817748708, %v3923_v33, %v3970_v30 }
 0x19e   : > { %v3925_v50 = vpop.f32.mrb[64].mxu1  ;;  %v3929_v58 = vadd.f32 %v2655_v10, %v3753_v14  ;;  %v1922_v14 = vadd.s32 18, %v3877_v12  ;;  %v3982_v25 = vmul.u32.u64.low 3817748708, %v3932_v43  ;;  %v3983_v10 = vmul.u32.u64.high 3817748708, %v3932_v43, %v3982_v25 }
 0x19f   : > { %v1304_v44 = vpop.f32.mrb[28].mxu0  ;;  %v3934_v9 = vpop.f32.mrb[65].mxu1 }
 0x1a0   : > { %v2657_v21 = vadd.f32 %v1304_v44, %v3702_v19  ;;  %v1306_v39 = vpop.f32.mrb[29].mxu0  ;;  %v1798_v19 = vmul.u32 18, %v1797_v18  ;;  %v1940_v2 = vsel %vm3964_vm5, %v1922_v14, %v3877_v12  ;;  %v1787_v18 = vmul.u32 18, %v1786_v52 }
 0x1a1   : > { %v1699_v14 = vmul.u32 18, %v1698_v37  ;;  %v4018_v52 = vadd.s32 112, %v3710_v34  ;;  %vm4024_vm7 = vcmp.lt.s32.totalorder %v1940_v2, 16 }
 0x1a2   : > { %v2359_v3 = vpop.f32.mrb[66].mxu1  ;;  %v3986_v0 = vadd.f32 %v2657_v21, %v3765_v31  ;;  %v4003_v31 = vsel %vm3949_vm3, 1.0, %v2834_v36  ;;  %v1709_v21 = vshrl.u32 %v3911_v32, 4  ;;  %v4014_v12 = vsub.s32 %v3797_v13, %v1798_v19 }
 0x1a3   : > { %v1309_v57 = vpop.f32.mrb[30].mxu0  ;;  %v3989_v29 = vadd.f32 %v3723_v4, %v2359_v3  ;;  %v3991_v24 = vpop.f32.mrb[67].mxu1  ;;  %v4008_v4 = vsel %vm3953_vm4, 1.0, %v2834_v36  ;;  %v4037_v45 = vsub.s32 %v3812_v28, %v1787_v18  ;;  %v4060_v28 = vsub.s32 %v3830_v15, %v1699_v14 }
 0x1a4   : > { %v2659_v48 = vadd.f32 %v1309_v57, %v3704_v22  ;;  %v1311_v44 = vpop.f32.mrb[31].mxu0  ;;  %v1819_v22 = vshrl.u32 %v3903_v26, 4  ;;  %v4040_v19 = vmul.u32.u64.low 3817748708, %v3997_v11  ;;  %v4041_v37 = vmul.u32.u64.high 3817748708, %v3997_v11, %v4040_v19 }
 0x1a5   : > { %1638 = vst [vmem:[%s3976_s4 + $0x28] sm:$0xff] %v3989_v29  ;;  %v1710_v57 = vmul.u32 18, %v1709_v21  ;;  %vm1879_vm10 = vcmp.ne.s32.totalorder %v4014_v12, 0  ;;  %vm1897_vm12 = vcmp.lt.s32.totalorder %v4014_v12, 0  ;;  %v1933_v18 = vadd.s32 18, %v4014_v12 }
 0x1a6   : > { %v2362_v39 = vpop.f32.mrb[68].mxu1  ;;  %v4031_v13 = vadd.f32 %v2659_v48, %v3773_v35  ;;  %v1923_v35 = vadd.s32 18, %v3979_v20  ;;  %v1808_v48 = vshrl.u32 %v3983_v10, 4  ;;  %vm1878_vm13 = vcmp.ne.s32.totalorder %v4037_v45, 0  ;;  %vm4102_vm1 = vmand %vm1897_vm12, %vm1879_vm10 }
 0x1a7   : > { %v1314_v26 = vpop.f32.mrb[32].mxu0  ;;  %v4034_v32 = vadd.f32 %v3751_v27, %v2362_v39  ;;  %v1574_v60 = vpop.f32.mrb[69].mxu1  ;;  %vm1896_vm14 = vcmp.lt.s32.totalorder %v4037_v45, 0  ;;  %vm1870_vm15 = vcmp.ne.s32.totalorder %v4060_v28, 0  ;;  %vm1888_vm0 = vcmp.lt.s32.totalorder %v4060_v28, 0 }
 0x1a8   : > { %v2661_v30 = vadd.f32 %v1314_v26, %v3706_v23  ;;  %v1316_v3 = vpop.f32.mrb[33].mxu0  ;;  %v4045_v25 = vadd.f32 %v3738_v7, %v1574_v60  ;;  %v1820_v23 = vmul.u32 18, %v1819_v22  ;;  %v1720_v7 = vshrl.u32 %v3971_v17, 4  ;;  %vm4120_vm2 = vmand %vm1896_vm14, %vm1878_vm13 }
 0x1a9   : > { %1640 = vst [vmem:[%s3976_s4 + $0x38] sm:$0xff] %v4034_v32  ;;  %v4077_v17 = vadd.s32 18, %v4037_v45  ;;  %vm4140_vm4 = vmand %vm1888_vm0, %vm1870_vm15 }
 0x1aa   : > { %1639 = vst [vmem:[%s3976_s4 + $0x30] sm:$0xff] %v4045_v25  ;;  %v2365_v2 = vpop.f32.mrb[70].mxu1  ;;  %v4069_v44 = vadd.f32 %v2661_v30, %v3802_v51  ;;  %v1941_v51 = vsel %vm4055_vm11, %v1923_v35, %v3979_v20  ;;  %v4092_v26 = vsub.s32 %v3849_v46, %v1820_v23  ;;  %v1809_v20 = vmul.u32 18, %v1808_v48 }
 0x1ab   : > { %v1319_v21 = vpop.f32.mrb[34].mxu0  ;;  %v4072_v15 = vadd.f32 %v3771_v53, %v2365_v2  ;;  %v1584_v22 = vpop.f32.mrb[71].mxu1  ;;  %v4087_v53 = vsub.s32 %v3862_v40, %v1710_v57  ;;  %v4107_v46 = vmul.u32.u64.low 3817748708, %v4018_v52  ;;  %v4108_v60 = vmul.u32.u64.high 3817748708, %v4018_v52, %v4107_v46 }
 0x1ac   : > { %v2663_v14 = vadd.f32 %v1319_v21, %v3708_v5  ;;  %v1321_v39 = vpop.f32.mrb[35].mxu0  ;;  %v4081_v10 = vadd.f32 %v3763_v41, %v1584_v22  ;;  %v1721_v5 = vmul.u32 18, %v1720_v7  ;;  %vm4124_vm3 = vcmp.lt.s32.totalorder %v1941_v51, 16 }
 0x1ad   : > { %1642 = vst [vmem:[%s3976_s4 + $0x48] sm:$0xff] %v4072_v15  ;;  %v4130_v23 = vadd.s32 128, %v3710_v34  ;;  %vm1871_vm5 = vcmp.ne.s32.totalorder %v4087_v53, 0  ;;  %vm1889_vm8 = vcmp.lt.s32.totalorder %v4087_v53, 0  ;;  %v1951_v21 = vsel %vm4102_vm1, %v1933_v18, %v4014_v12 }
 0x1ae   : > { %1641 = vst [vmem:[%s3976_s4 + $0x40] sm:$0xff] %v4081_v10  ;;  %v2368_v41 = vpop.f32.mrb[72].mxu1  ;;  %v4111_v19 = vadd.f32 %v2663_v14, %v3832_v1  ;;  %v1924_v1 = vadd.s32 18, %v4060_v28  ;;  %v4160_v22 = vsub.s32 %v3923_v33, %v1721_v5  ;;  %v1950_v62 = vsel %vm4120_vm2, %v4077_v17, %v4037_v45 }
 0x1af   : > { %v1389_v30 = vpop.f32.mrb[0].mxu0  ;;  %v4114_v3 = vadd.f32 %v3841_v38, %v2368_v41  ;;  %v1594_v35 = vpop.f32.mrb[73].mxu1  ;;  %v1841_v39 = vshrl.u32 %v4041_v37, 4  ;;  %v1925_v51 = vadd.s32 18, %v4087_v53  ;;  %v2266_v33 = vsel %vm4124_vm3, 1.0, %v2834_v36 }
 0x1b0   : > { %v2634_v38 = vadd.f32 %v1389_v30, %v3678_v54  ;;  %v1391_v7 = vpop.f32.mrb[1].mxu0  ;;  %v4134_v2 = vadd.f32 %v3800_v6, %v1594_v35  ;;  %v4149_v54 = vsel %vm4020_vm6, 1.0, %v2834_v36  ;;  %v2265_v6 = vsel %vm4024_vm7, 1.0, %v2834_v36  ;;  %vm4187_vm6 = vmand %vm1889_vm8, %vm1871_vm5 }
 0x1b1   : > { %1644 = vst [vmem:[%s3976_s4 + $0x58] sm:$0xff] %v4114_v3  ;;  %v4178_v12 = vadd.s32 18, %v4092_v26  ;;  %v1942_v45 = vsel %vm4140_vm4, %v1924_v1, %v4060_v28  ;;  %vm4192_vm7 = vcmp.lt.s32.totalorder %v1951_v21, 16  ;;  %vm1881_vm9 = vcmp.ne.s32.totalorder %v4092_v26, 0 }
 0x1b2   : > { %v1545_v14 = vadd.f32 %v2634_v38, %v3891_v16  ;;  %1643 = vst [vmem:[%s3976_s4 + $0x50] sm:$0xff] %v4134_v2  ;;  %v2371_v8 = vpop.f32.mrb[74].mxu1  ;;  %vm1899_vm10 = vcmp.lt.s32.totalorder %v4092_v26, 0  ;;  %v4200_v5 = vsub.s32 %v3932_v43, %v1809_v20  ;;  %vm1872_vm11 = vcmp.ne.s32.totalorder %v4160_v22, 0 }
 0x1b3   : > { %v1394_v41 = vpop.f32.mrb[2].mxu0  ;;  %v4175_v16 = vadd.f32 %v3929_v58, %v2371_v8  ;;  %v1604_v18 = vpop.f32.mrb[75].mxu1  ;;  %v4203_v40 = vmul.u32.u64.low 3817748708, %v4130_v23  ;;  %v4204_v46 = vmul.u32.u64.high 3817748708, %v4130_v23, %v4203_v40  ;;  %vm1890_vm12 = vcmp.lt.s32.totalorder %v4160_v22, 0  ;;  %vm4296_vm4 = vmand %vm1899_vm10, %vm1881_vm9 }
 0x1b4   : > { %1633 = vst [vmem:[%s3976_s4] sm:$0xff] %v1545_v14  ;;  %v2635_v17 = vadd.f32 %v1394_v41, %v3680_v55  ;;  %v1396_v28 = vpop.f32.mrb[3].mxu0  ;;  %v4209_v30 = vadd.f32 %v3889_v42, %v1604_v18  ;;  %v4212_v55 = vadd.s32 136, %v3710_v34  ;;  %v2054_v35 = vmul.f32 %v1545_v14, %v1545_v14  ;;  %vm4244_vm15 = vmand %vm1890_vm12, %vm1872_vm11 }
 0x1b5   : > { %1646 = vst [vmem:[%s3976_s4 + $0x68] sm:$0xff] %v4175_v16  ;;  %vm4216_vm13 = vcmp.lt.s32.totalorder %v1950_v62, 16  ;;  %vm4221_vm14 = vcmp.lt.s32.totalorder %v1942_v45, 16  ;;  %v1943_v34 = vsel %vm4187_vm6, %v1925_v51, %v4087_v53  ;;  %v2012_v27 = vmul.f32 %v2265_v6, %v1545_v14 }
 0x1b6   : > { %v1550_v20 = vadd.f32 %v2635_v17, %v3883_v59  ;;  %v2374_v42 = vpop.f32.mrb[76].mxu1  ;;  %1645 = vst [vmem:[%s3976_s4 + $0x60] sm:$0xff] %v4209_v30  ;;  %v1830_v59 = vshrl.u32 %v4108_v60, 4  ;;  %v1926_v48 = vadd.s32 18, %v4160_v22  ;;  %v2267_v60 = vsel %vm4221_vm14, 1.0, %v2834_v36 }
 0x1b7   : > { %v1399_v1 = vpop.f32.mrb[4].mxu0  ;;  %v4231_v38 = vadd.f32 %v4031_v13, %v2374_v42  ;;  %v1614_v7 = vpop.f32.mrb[77].mxu1  ;;  %vm4253_vm0 = vcmp.lt.s32.totalorder %v1943_v34, 16  ;;  %v2072_v41 = vmul.f32 %v2265_v6, %v2054_v35  ;;  %vm1880_vm1 = vcmp.ne.s32.totalorder %v4200_v5, 0 }
 0x1b8   : > { %1634 = vst [vmem:[%s3976_s4 + $0x8] sm:$0xff] %v1550_v20  ;;  %v2013_v21 = vmul.f32 %v2266_v33, %v1550_v20  ;;  %v2055_v62 = vmul.f32 %v1550_v20, %v1550_v20  ;;  %v2636_v8 = vadd.f32 %v1399_v1, %v3682_v61  ;;  %v1401_v53 = vpop.f32.mrb[5].mxu0  ;;  %v4238_v14 = vadd.f32 %v3986_v0, %v1614_v7 }
 0x1b9   : > { %1648 = vst [vmem:[%s3976_s4 + $0x78] sm:$0xff] %v4231_v38  ;;  %v4258_v0 = vmul.u32.u64.low 3817748708, %v4212_v55  ;;  %v4259_v51 = vmul.u32.u64.high 3817748708, %v4212_v55, %v4258_v0  ;;  %v1842_v28 = vmul.u32 18, %v1841_v39  ;;  %v1944_v6 = vsel %vm4244_vm15, %v1926_v48, %v4160_v22 }
 0x1ba   : > { %v2030_v18 = vadd.f32 %v2013_v21, %v2012_v27  ;;  %v2073_v45 = vmul.f32 %v2266_v33, %v2055_v62  ;;  %v1555_v37 = vadd.f32 %v2636_v8, %v3934_v9  ;;  %1647 = vst [vmem:[%s3976_s4 + $0x70] sm:$0xff] %v4238_v14  ;;  %v2377_v17 = vpop.f32.mrb[78].mxu1  ;;  %vm1898_vm2 = vcmp.lt.s32.totalorder %v4200_v5, 0 }
 0x1bb   : > { %v1404_v40 = vpop.f32.mrb[6].mxu0  ;;  %v4266_v20 = vadd.f32 %v4111_v19, %v2377_v17  ;;  %v1624_v57 = vpop.f32.mrb[79].mxu1  ;;  %v1831_v39 = vmul.u32 18, %v1830_v59  ;;  %v2268_v19 = vsel %vm4253_vm0, 1.0, %v2834_v36  ;;  %vm4283_vm3 = vcmp.lt.s32.totalorder %v1944_v6, 16  ;;  %vm4311_vm5 = vmand %vm1898_vm2, %vm1880_vm1 }
 0x1bc   : > { %v2090_v35 = vadd.f32 %v2073_v45, %v2072_v41  ;;  %1635 = vst [vmem:[%s3976_s4 + $0x10] sm:$0xff] %v1555_v37  ;;  %v2014_v33 = vmul.f32 %v2267_v60, %v1555_v37  ;;  %v2056_v9 = vmul.f32 %v1555_v37, %v1555_v37  ;;  %v2637_v42 = vadd.f32 %v1404_v40, %v3684_v49  ;;  %v1406_v34 = vpop.f32.mrb[7].mxu0 }
 0x1bd   : > { %1650 = vst [vmem:[%s3976_s4 + $0x88] sm:$0xff] %v4266_v20  ;;  %v4280_v22 = vadd.f32 %v4069_v44, %v1624_v57  ;;  %v4290_v59 = vsel %vm4192_vm7, 1.0, %v2834_v36  ;;  %v1934_v48 = vadd.s32 18, %v4200_v5  ;;  %v1852_v21 = vshrl.u32 %v4204_v46, 4 }
 0x1be   : > { %v2031_v27 = vadd.f32 %v2030_v18, %v2014_v33  ;;  %v2074_v1 = vmul.f32 %v2267_v60, %v2056_v9  ;;  %v1560_v7 = vadd.f32 %v2637_v42, %v3925_v50  ;;  %v4302_v50 = vsub.s32 %v3997_v11, %v1842_v28 }
 0x1bf   : > { %1649 = vst [vmem:[%s3976_s4 + $0x80] sm:$0xff] %v4280_v22  ;;  %v1409_v58 = vpop.f32.mrb[8].mxu0  ;;  %v4320_v46 = vsel %vm4216_vm13, 1.0, %v2834_v36  ;;  %v4323_v61 = vsub.s32 %v4018_v52, %v1831_v39  ;;  %v1863_v0 = vshrl.u32 %v4259_v51, 4  ;;  %v2269_v41 = vsel %vm4283_vm3, 1.0, %v2834_v36 }
 0x1c0   : > { %v2091_v8 = vadd.f32 %v2090_v35, %v2074_v1  ;;  %1636 = vst [vmem:[%s3976_s4 + $0x18] sm:$0xff] %v1560_v7  ;;  %v2015_v53 = vmul.f32 %v2268_v19, %v1560_v7  ;;  %v2057_v13 = vmul.f32 %v1560_v7, %v1560_v7  ;;  %v2638_v11 = vadd.f32 %v1409_v58, %v3686_v63  ;;  %v1411_v60 = vpop.f32.mrb[9].mxu0 }
 0x1c1   : > { %v1953_v63 = vsel %vm4296_vm4, %v4178_v12, %v4092_v26  ;;  %v1952_v52 = vsel %vm4311_vm5, %v1934_v48, %v4200_v5  ;;  %vm1883_vm8 = vcmp.ne.s32.totalorder %v4302_v50, 0  ;;  %vm1901_vm6 = vcmp.lt.s32.totalorder %v4302_v50, 0 }
 0x1c2   : > { %v2032_v18 = vadd.f32 %v2031_v27, %v2015_v53  ;;  %v2075_v45 = vmul.f32 %v2268_v19, %v2057_v13  ;;  %v1565_v43 = vadd.f32 %v2638_v11, %v3991_v24  ;;  %v1853_v51 = vmul.u32 18, %v1852_v21  ;;  %vm4349_vm10 = vmand %vm1901_vm6, %vm1883_vm8 }
 0x1c3   : > { %v2059_v37 = vmul.f32 %v3989_v29, %v3989_v29  ;;  %v1937_v12 = vadd.s32 18, %v4302_v50  ;;  %vm1882_vm7 = vcmp.ne.s32.totalorder %v4323_v61, 0  ;;  %vm1900_vm9 = vcmp.lt.s32.totalorder %v4323_v61, 0 }
 0x1c4   : > { %v2092_v17 = vadd.f32 %v2091_v8, %v2075_v45  ;;  %1637 = vst [vmem:[%s3976_s4 + $0x20] sm:$0xff] %v1565_v43  ;;  %v2016_v28 = vmul.f32 %v2269_v41, %v1565_v43  ;;  %v2058_v26 = vmul.f32 %v1565_v43, %v1565_v43  ;;  %v1864_v24 = vmul.u32 18, %v1863_v0  ;;  %vm4364_vm12 = vmand %vm1900_vm9, %vm1882_vm7 }
 0x1c5   : > { %v2017_v5 = vmul.f32 %v3939_v56, %v3989_v29  ;;  %v2060_v40 = vmul.f32 %v4045_v25, %v4045_v25  ;;  %v2061_v33 = vmul.f32 %v4034_v32, %v4034_v32  ;;  %vm4355_vm11 = vcmp.lt.s32.totalorder %v1953_v63, 16 }
 0x1c6   : > { %v2033_v6 = vadd.f32 %v2032_v18, %v2016_v28  ;;  %v2076_v35 = vmul.f32 %v2269_v41, %v2058_v26  ;;  %v1936_v42 = vadd.s32 18, %v4323_v61  ;;  %v1854_v29 = vsub.s32 %v4130_v23, %v1853_v51 }
 0x1c7   : > { %v2077_v34 = vmul.f32 %v3939_v56, %v2059_v37  ;;  %v2018_v39 = vmul.f32 %v4003_v31, %v4045_v25  ;;  %v2019_v7 = vmul.f32 %v3944_v47, %v4034_v32  ;;  %vm4370_vm13 = vcmp.lt.s32.totalorder %v1952_v52, 16 }
 0x1c8   : > { %v2034_v27 = vadd.f32 %v2033_v6, %v2017_v5  ;;  %v2093_v1 = vadd.f32 %v2092_v17, %v2076_v35  ;;  %v1955_v56 = vsel %vm4349_vm10, %v1937_v12, %v4302_v50  ;;  %v1865_v23 = vsub.s32 %v4212_v55, %v1864_v24 }
 0x1c9   : > { %v2078_v25 = vmul.f32 %v4003_v31, %v2060_v40  ;;  %v2062_v44 = vmul.f32 %v4081_v10, %v4081_v10  ;;  %v2079_v58 = vmul.f32 %v3944_v47, %v2061_v33  ;;  %v1954_v32 = vsel %vm4364_vm12, %v1936_v42, %v4323_v61 }
 0x1ca   : > { %v2035_v48 = vadd.f32 %v2034_v27, %v2018_v39  ;;  %v2094_v21 = vadd.f32 %v2093_v1, %v2077_v34  ;;  %vm1884_vm14 = vcmp.ne.s32.totalorder %v1854_v29, 0  ;;  %vm1902_vm15 = vcmp.lt.s32.totalorder %v1854_v29, 0 }
 0x1cb   : > { %v2063_v50 = vmul.f32 %v4072_v15, %v4072_v15  ;;  %v2020_v55 = vmul.f32 %v4149_v54, %v4081_v10  ;;  %v2021_v8 = vmul.f32 %v4008_v4, %v4072_v15  ;;  %vm1885_vm0 = vcmp.ne.s32.totalorder %v1865_v23, 0  ;;  %vm4394_vm2 = vmand %vm1902_vm15, %vm1884_vm14 }
 0x1cc   : > { %v2036_v31 = vadd.f32 %v2035_v48, %v2019_v7  ;;  %v2095_v62 = vadd.f32 %v2094_v21, %v2078_v25  ;;  %vm1903_vm1 = vcmp.lt.s32.totalorder %v1865_v23, 0  ;;  %v1938_v47 = vadd.s32 18, %v1854_v29 }
 0x1cd   : > { %v2080_v53 = vmul.f32 %v4149_v54, %v2062_v44  ;;  %v2064_v13 = vmul.f32 %v4134_v2, %v4134_v2  ;;  %v2065_v10 = vmul.f32 %v4114_v3, %v4114_v3  ;;  %v2278_v15 = vsel %vm4355_vm11, 1.0, %v2834_v36  ;;  %vm4409_vm3 = vmand %vm1903_vm1, %vm1885_vm0 }
 0x1ce   : > { %v2037_v60 = vadd.f32 %v2036_v31, %v2020_v55  ;;  %v2096_v61 = vadd.f32 %v2095_v62, %v2079_v58  ;;  %v2277_v54 = vsel %vm4370_vm13, 1.0, %v2834_v36  ;;  %v1939_v0 = vadd.s32 18, %v1865_v23 }
 0x1cf   : > { %v2081_v41 = vmul.f32 %v4008_v4, %v2063_v50  ;;  %v2022_v63 = vmul.f32 %v4320_v46, %v4134_v2  ;;  %v2023_v52 = vmul.f32 %v4290_v59, %v4114_v3  ;;  %vm1973_vm4 = vcmp.lt.s32.totalorder %v1955_v56, 16 }
 0x1d0   : > { %v2038_v45 = vadd.f32 %v2037_v60, %v2021_v8  ;;  %v2097_v43 = vadd.f32 %v2096_v61, %v2080_v53  ;;  %vm1972_vm5 = vcmp.lt.s32.totalorder %v1954_v32, 16  ;;  %v1956_v51 = vsel %vm4394_vm2, %v1938_v47, %v1854_v29 }
 0x1d1   : > { %v2082_v37 = vmul.f32 %v4320_v46, %v2064_v13  ;;  %v2066_v4 = vmul.f32 %v4209_v30, %v4209_v30  ;;  %v2083_v28 = vmul.f32 %v4290_v59, %v2065_v10  ;;  %v1957_v26 = vsel %vm4409_vm3, %v1939_v0, %v1865_v23 }
 0x1d2   : > { %v2039_v2 = vadd.f32 %v2038_v45, %v2022_v63  ;;  %v2098_v17 = vadd.f32 %v2097_v43, %v2081_v41  ;;  %v2067_v3 = vmul.f32 %v4175_v16, %v4175_v16  ;;  %v2024_v12 = vmul.f32 %v2277_v54, %v4209_v30 }
 0x1d3   : > { %v2025_v40 = vmul.f32 %v2278_v15, %v4175_v16  ;;  %v2280_v46 = vsel %vm1973_vm4, 1.0, %v2834_v36  ;;  %v2279_v57 = vsel %vm1972_vm5, 1.0, %v2834_v36  ;;  %vm1974_vm8 = vcmp.lt.s32.totalorder %v1956_v51, 16 }
 0x1d4   : > { %v2040_v24 = vadd.f32 %v2039_v2, %v2023_v52  ;;  %v2099_v5 = vadd.f32 %v2098_v17, %v2082_v37  ;;  %v2084_v6 = vmul.f32 %v2277_v54, %v2066_v4  ;;  %v2068_v59 = vmul.f32 %v4238_v14, %v4238_v14 }
 0x1d5   : > { %v2069_v9 = vmul.f32 %v4231_v38, %v4231_v38  ;;  %vm1975_vm6 = vcmp.lt.s32.totalorder %v1957_v26, 16  ;;  %v2085_v30 = vmul.f32 %v2278_v15, %v2067_v3  ;;  %v2026_v42 = vmul.f32 %v2279_v57, %v4238_v14 }
 0x1d6   : > { %v2041_v35 = vadd.f32 %v2040_v24, %v2024_v12  ;;  %v2100_v33 = vadd.f32 %v2099_v5, %v2083_v28  ;;  %v2027_v34 = vmul.f32 %v2280_v46, %v4231_v38  ;;  %v2281_v39 = vsel %vm1974_vm8, 1.0, %v2834_v36 }
 0x1d7   : > { %v2086_v19 = vmul.f32 %v2279_v57, %v2068_v59  ;;  %v2070_v27 = vmul.f32 %v4280_v22, %v4280_v22  ;;  %v2087_v49 = vmul.f32 %v2280_v46, %v2069_v9  ;;  %v2282_v56 = vsel %vm1975_vm6, 1.0, %v2834_v36 }
 0x1d8   : > { %v2042_v29 = vadd.f32 %v2041_v35, %v2025_v40  ;;  %v2101_v16 = vadd.f32 %v2100_v33, %v2084_v6  ;;  %v2071_v23 = vmul.f32 %v4266_v20, %v4266_v20  ;;  %v2028_v14 = vmul.f32 %v2281_v39, %v4280_v22 }
 0x1d9   : > { %v2029_v44 = vmul.f32 %v2282_v56, %v4266_v20  ;;  %v2088_v48 = vmul.f32 %v2281_v39, %v2070_v27 }
 0x1da   : > { %v2043_v1 = vadd.f32 %v2042_v29, %v2026_v42  ;;  %v2102_v7 = vadd.f32 %v2101_v16, %v2085_v30  ;;  %v2089_v32 = vmul.f32 %v2282_v56, %v2071_v23 }
 0x1dc   : > { %v2044_v25 = vadd.f32 %v2043_v1, %v2027_v34  ;;  %v2103_v38 = vadd.f32 %v2102_v7, %v2086_v19 }
 0x1de   : > { %v2045_v21 = vadd.f32 %v2044_v25, %v2028_v14  ;;  %v2104_v58 = vadd.f32 %v2103_v38, %v2087_v49 }
 0x1e0   : > { %v2046_v50 = vadd.f32 %v2045_v21, %v2029_v44  ;;  %v2105_v55 = vadd.f32 %v2104_v58, %v2088_v48 }
 0x1e2   : > { %v2047_v31 = vrot.slane %v2046_v50, 4  ;;  %v2106_v62 = vadd.f32 %v2105_v55, %v2089_v32 }
 0x1e4   : > { %v2048_v36 = vadd.f32 %v2047_v31, %v2046_v50  ;;  %v2107_v8 = vrot.slane %v2106_v62, 4 }
 0x1e6   : > { %v2049_v47 = vrot.slane %v2048_v36, 2  ;;  %v2108_v53 = vadd.f32 %v2107_v8, %v2106_v62 }
 0x1e8   : > { %v2050_v22 = vadd.f32 %v2049_v47, %v2048_v36  ;;  %v2109_v13 = vrot.slane %v2108_v53, 2 }
 0x1ea   : > { %v2051_v11 = vrot.slane %v2050_v22, 1  ;;  %v2110_v60 = vadd.f32 %v2109_v13, %v2108_v53 }
 0x1ec   : > { %v2052_v20 = vadd.f32 %v2051_v11, %v2050_v22  ;;  %v2111_v61 = vrot.slane %v2110_v60, 1 }
 0x1ee   : > { %2053 = vst [vmem:[%s227_s11] sm:$0x1] %v2052_v20  ;;  %v2112_v10 = vadd.f32 %v2111_v61, %v2110_v60 }
 0x1f0   : > { %2113 = vst [vmem:[%s227_s11 + $0x1] sm:$0x1] %v2112_v10 }
 0x1f1 PF: > { %s14_s16 = sadd.s32 1, %s2831_s16   ;;  %s4531_s12 = smov %s2823_s14 }
 0x1f2   : > { %p11_p7 = scmp.ge.s32.totalorder %s14_s16, 6   ;;  %s4532_s13 = smov %s2827_s15 }
 0x1f3   : > { %s4533_s14 = smov %s4536_s17  ;;  %s4534_s15 = smov %s4540_s18 }
 0x1f4   :  { %13 = sbr.rel (!%p11_p7) target bundleno = 3 (0x3), region = 70 }

</bundles_post_ra>
